<compile_context>
chip_gen: v7x
topology: tpu7x:2x2x1
jax: 0.10.0
libtpu: 0.0.40
codegen_flags: <defaults>
</compile_context>

<pallas_src>
import jax
import jax.numpy as jnp
from jax.experimental import pallas as pl
from jax.experimental.pallas import tpu as pltpu

# -----------------------------------------------------------------------------
# Small synthetic configs (real models are 768/2048-dim; scaled down per task)
# -----------------------------------------------------------------------------
BATCH = 2
MAX_LEN = 8          # stands in for max_length=77
VOCAB = 99

CLIP_D, CLIP_H, CLIP_FF, CLIP_LAYERS = 32, 4, 64, 2
CLIP_DH = CLIP_D // CLIP_H

T5_D, T5_H, T5_DH, T5_FF, T5_LAYERS = 32, 4, 8, 64, 2
T5_INNER = T5_H * T5_DH
T5_REL_BUCKETS, T5_REL_MAXDIST = 32, 128


# -----------------------------------------------------------------------------
# In-kernel helpers (traced inside Pallas kernels; activations are 2-D (B*S, D))
# -----------------------------------------------------------------------------
def _ln(x, g, b, eps):
    mu = jnp.mean(x, axis=-1, keepdims=True)
    var = jnp.mean((x - mu) * (x - mu), axis=-1, keepdims=True)
    return (x - mu) * jax.lax.rsqrt(var + eps) * g + b


def _rms(x, g, eps):
    var = jnp.mean(x * x, axis=-1, keepdims=True)
    return x * jax.lax.rsqrt(var + eps) * g


def _softmax_rows(s):
    s = s - jnp.max(s, axis=-1, keepdims=True)
    p = jnp.exp(s)
    return p * pl.reciprocal(jnp.sum(p, axis=-1, keepdims=True), approx=True)


def _split_heads(x2d, base, B, S, H, Dh):
    """(B*S, *) -> (H*B, S, Dh); batch index hb = h*B + b (head-major).

    Per-head slices are lane slices of the fused projection result; the
    head/batch collapse uses only leading-axis concat + leading-dim reshapes
    (no minor-dim relayout), so the two attention matmuls below run as a single
    batched einsum over all heads.
    """
    return jnp.concatenate(
        [x2d[:, base + h * Dh: base + (h + 1) * Dh].reshape(B, S, Dh)
         for h in range(H)], axis=0)


def _merge_heads(a, B, S, H, Dh):
    """(H*B, S, Dh) -> (B*S, H*Dh) with heads concatenated along lanes."""
    return jnp.concatenate(
        [a[h * B:(h + 1) * B] for h in range(H)], axis=-1).reshape(B * S, H * Dh)


# -----------------------------------------------------------------------------
# Fused Pallas kernels — one per ENCODER (grid over layers, x resident in VMEM)
# -----------------------------------------------------------------------------
def _clip_stack_kernel(x_ref, g1_ref, b1_ref, wqkv_ref, bqkv_ref, wo_ref, bo_ref,
                       g2_ref, b2_ref, w1_ref, b1m_ref, w2_ref, b2m_ref,
                       gf_ref, bf_ref, o_ref, x_sc):
    l = pl.program_id(0)
    B, S, H, Dh, D = BATCH, MAX_LEN, CLIP_H, CLIP_DH, CLIP_D

    @pl.when(l == 0)
    def _():                                   # load embeddings once
        x_sc[...] = x_ref[...]

    x = x_sc[...]                              # (B*S, D) f32 residual stream

    # ---- attention sub-block (pre-LN, causal) ----
    h = _ln(x, g1_ref[...], b1_ref[...], 1e-5).astype(jnp.bfloat16)
    qkv = jnp.dot(h, wqkv_ref[...],
                  preferred_element_type=jnp.float32) + bqkv_ref[...]   # (B*S, 3D)
    q = _split_heads(qkv, 0, B, S, H, Dh) * (Dh ** -0.5)                # (H*B,S,Dh)
    k = _split_heads(qkv, D, B, S, H, Dh)
    v = _split_heads(qkv, 2 * D, B, S, H, Dh)

    # causal mask computed in-kernel (no HBM mask buffer)
    qi = jax.lax.broadcasted_iota(jnp.int32, (S, S), 0)
    kj = jax.lax.broadcasted_iota(jnp.int32, (S, S), 1)
    causal = (kj <= qi)[None, :, :]                                      # (1,S,S)

    # one batched einsum pair over all heads (batch dim = H*B)
    s = jnp.einsum('bqd,bkd->bqk', q.astype(jnp.bfloat16),
                   k.astype(jnp.bfloat16), preferred_element_type=jnp.float32)
    s = jnp.where(causal, s, -1e9)
    p = _softmax_rows(s)
    a = jnp.einsum('bqk,bkd->bqd', p.astype(jnp.bfloat16),
                   v.astype(jnp.bfloat16), preferred_element_type=jnp.float32)
    a = _merge_heads(a, B, S, H, Dh).astype(jnp.bfloat16)                # (B*S, D)
    x = x + jnp.dot(a, wo_ref[...],
                    preferred_element_type=jnp.float32) + bo_ref[...]

    # ---- MLP sub-block (pre-LN, quick-gelu) ----
    h = _ln(x, g2_ref[...], b2_ref[...], 1e-5).astype(jnp.bfloat16)
    m = jnp.dot(h, w1_ref[...], preferred_element_type=jnp.float32) + b1m_ref[...]
    m = m * jax.nn.sigmoid(1.702 * m)                                    # quick_gelu
    x = x + (jnp.dot(m.astype(jnp.bfloat16), w2_ref[...],
                     preferred_element_type=jnp.float32) + b2m_ref[...])

    x_sc[...] = x

    @pl.when(l == pl.num_programs(0) - 1)
    def _():                                   # final LayerNorm, single HBM store
        o_ref[...] = _ln(x, gf_ref[...], bf_ref[...], 1e-5)


def _t5_stack_kernel(x_ref, bias_ref, g1_ref, wqkv_ref, wo_ref,
                     g2_ref, wi_ref, woff_ref, gf_ref, o_ref, x_sc):
    l = pl.program_id(0)
    B, S, H, Dh = BATCH, MAX_LEN, T5_H, T5_DH
    IN, FF = T5_INNER, T5_FF

    @pl.when(l == 0)
    def _():
        x_sc[...] = x_ref[...]

    x = x_sc[...]                              # (B*S, D) f32 residual stream

    # ---- self-attention sub-block (pre-RMSNorm, rel-pos bias, no scaling) ----
    h = _rms(x, g1_ref[...], 1e-6).astype(jnp.bfloat16)
    qkv = jnp.dot(h, wqkv_ref[...], preferred_element_type=jnp.float32)  # (B*S, 3*IN)
    q = _split_heads(qkv, 0, B, S, H, Dh)           # T5: no 1/sqrt(d) scaling
    k = _split_heads(qkv, IN, B, S, H, Dh)
    v = _split_heads(qkv, 2 * IN, B, S, H, Dh)

    s = jnp.einsum('bqd,bkd->bqk', q.astype(jnp.bfloat16),
                   k.astype(jnp.bfloat16), preferred_element_type=jnp.float32)
    s = s + bias_ref[...]                           # (H*B,S,S) rel-pos bias (resident)
    p = _softmax_rows(s)
    a = jnp.einsum('bqk,bkd->bqd', p.astype(jnp.bfloat16),
                   v.astype(jnp.bfloat16), preferred_element_type=jnp.float32)
    a = _merge_heads(a, B, S, H, Dh).astype(jnp.bfloat16)
    x = x + jnp.dot(a, wo_ref[...], preferred_element_type=jnp.float32)

    # ---- gated-gelu FF sub-block (wi_0 | wi_1 fused into one matmul) ----
    h = _rms(x, g2_ref[...], 1e-6).astype(jnp.bfloat16)
    hi = jnp.dot(h, wi_ref[...], preferred_element_type=jnp.float32)     # (B*S, 2*FF)
    h0 = hi[:, :FF]
    h1 = hi[:, FF:]
    c = 0.7978845608028654                          # sqrt(2/pi), gelu_new
    g = 0.5 * h0 * (1.0 + jnp.tanh(c * (h0 + 0.044715 * h0 * h0 * h0)))
    x = x + jnp.dot((g * h1).astype(jnp.bfloat16), woff_ref[...],
                    preferred_element_type=jnp.float32)

    x_sc[...] = x

    @pl.when(l == pl.num_programs(0) - 1)
    def _():                                   # final RMSNorm, single HBM store
        o_ref[...] = _rms(x, gf_ref[...], 1e-6)


# -----------------------------------------------------------------------------
# BlockSpec helpers: per-layer (leading L axis) vs. resident-across-layers
# -----------------------------------------------------------------------------
def _layer_spec(arr):
    nd = arr.ndim
    return pl.BlockSpec((None,) + tuple(arr.shape[1:]),
                        lambda l: (l,) + (0,) * (nd - 1))


def _resident_spec(shape):
    nd = len(shape)
    return pl.BlockSpec(tuple(shape), lambda l: (0,) * nd)


# -----------------------------------------------------------------------------
# Glue: T5 relative-position buckets (XLA-level, tiny integer math)
# -----------------------------------------------------------------------------
def t5_relative_position_bucket(rel_pos, num_buckets, max_distance):
    rb = jnp.zeros_like(rel_pos)
    num_buckets = num_buckets // 2
    rb = rb + (rel_pos > 0).astype(jnp.int32) * num_buckets
    n = jnp.abs(rel_pos)
    max_exact = num_buckets // 2
    is_small = n < max_exact
    n_safe = jnp.maximum(n, 1).astype(jnp.float32)
    val_if_large = max_exact + (
        jnp.log(n_safe / max_exact) / jnp.log(max_distance / max_exact)
        * (num_buckets - max_exact)
    ).astype(jnp.int32)
    val_if_large = jnp.minimum(val_if_large, num_buckets - 1)
    return rb + jnp.where(is_small, n, val_if_large)


# -----------------------------------------------------------------------------
# CLIP text encoder (last_hidden_state) — one pallas_call, grid over layers
# -----------------------------------------------------------------------------
def clip_encode(tokens, p):
    B, S = tokens.shape
    D, L, FF = CLIP_D, CLIP_LAYERS, CLIP_FF
    BS = B * S
    # embedding gather + positional add stay in XLA (data-dependent gather).
    x = (jnp.take(p["tok_emb"], tokens, axis=0)
         + p["pos_emb"][None, :S, :]).astype(jnp.float32).reshape(BS, D)

    args = (x, p["ln1_g"], p["ln1_b"], p["wqkv"], p["bqkv"], p["wo"], p["bo"],
            p["ln2_g"], p["ln2_b"], p["w1"], p["b1"], p["w2"], p["b2"],
            p["lnf_g"], p["lnf_b"])
    in_specs = ([_resident_spec(x.shape)]
                + [_layer_spec(a) for a in args[1:13]]
                + [_resident_spec(p["lnf_g"].shape),
                   _resident_spec(p["lnf_b"].shape)])

    flops = (L * 2 * BS * D * (3 * D + D + 2 * FF)
             + L * 4 * (CLIP_H * B) * S * S * CLIP_DH)
    transc = L * ((CLIP_H * B) * S * S + BS * FF)
    bytes_acc = sum(int(a.size) * a.dtype.itemsize for a in args) + BS * D * 4

    z = pl.pallas_call(
        _clip_stack_kernel,
        grid_spec=pltpu.PrefetchScalarGridSpec(
            num_scalar_prefetch=0,
            grid=(L,),
            in_specs=in_specs,
            out_specs=_resident_spec((BS, D)),
            scratch_shapes=[pltpu.VMEM((BS, D), jnp.float32)]),
        out_shape=jax.ShapeDtypeStruct((BS, D), jnp.float32),
        compiler_params=pltpu.CompilerParams(dimension_semantics=("arbitrary",)),
        cost_estimate=pl.CostEstimate(flops=int(flops), transcendentals=int(transc),
                                      bytes_accessed=int(bytes_acc)),
    )(*args)
    return z.reshape(B, S, D)


# -----------------------------------------------------------------------------
# T5 v1.1 encoder (last_hidden_state) — one pallas_call, grid over layers
# -----------------------------------------------------------------------------
def t5_encode(tokens, p):
    B, S = tokens.shape
    D, L, H = T5_D, T5_LAYERS, T5_H
    IN, FF = T5_INNER, T5_FF
    BS = B * S
    x = jnp.take(p["tok_emb"], tokens, axis=0).astype(jnp.float32).reshape(BS, D)

    # relative position bias: computed once in XLA as (H,S,S), repeated to the
    # kernel's collapsed (H*B) attention batch; it is a single VMEM-resident
    # input reused by every grid step (never re-tiled per layer / per batch).
    ctx = jnp.arange(S)[:, None]
    mem = jnp.arange(S)[None, :]
    buckets = t5_relative_position_bucket(mem - ctx, T5_REL_BUCKETS, T5_REL_MAXDIST)
    pos_bias = jnp.take(p["rel_bias"], buckets, axis=0).transpose(2, 0, 1)   # (H,S,S)
    bias_hb = jnp.repeat(pos_bias.astype(jnp.float32), B, axis=0)            # (H*B,S,S)

    args = (x, bias_hb, p["ln1_g"], p["wqkv"], p["wo"], p["ln2_g"],
            p["wi"], p["wo_ff"], p["lnf_g"])
    in_specs = ([_resident_spec(x.shape), _resident_spec(bias_hb.shape)]
                + [_layer_spec(a) for a in args[2:8]]
                + [_resident_spec(p["lnf_g"].shape)])

    flops = (L * 2 * BS * (D * 3 * IN + IN * D + D * 2 * FF + FF * D)
             + L * 4 * (H * B) * S * S * T5_DH)
    transc = L * ((H * B) * S * S + BS * FF)
    bytes_acc = sum(int(a.size) * a.dtype.itemsize for a in args) + BS * D * 4

    z = pl.pallas_call(
        _t5_stack_kernel,
        grid_spec=pltpu.PrefetchScalarGridSpec(
            num_scalar_prefetch=0,
            grid=(L,),
            in_specs=in_specs,
            out_specs=_resident_spec((BS, D)),
            scratch_shapes=[pltpu.VMEM((BS, D), jnp.float32)]),
        out_shape=jax.ShapeDtypeStruct((BS, D), jnp.float32),
        compiler_params=pltpu.CompilerParams(dimension_semantics=("arbitrary",)),
        cost_estimate=pl.CostEstimate(flops=int(flops), transcendentals=int(transc),
                                      bytes_accessed=int(bytes_acc)),
    )(*args)
    return z.reshape(B, S, D)


# -----------------------------------------------------------------------------
# FrozenCLIPT5Encoder.forward: returns [clip_z, t5_z]
# -----------------------------------------------------------------------------
def frozen_clip_t5_encode(tokens, clip_params, t5_params):
    # Two independent pallas_calls; XLA is free to overlap them
    # (on v7x: one encoder per TensorCore).
    clip_z = clip_encode(tokens, clip_params)
    t5_z = t5_encode(tokens, t5_params)
    return [clip_z, t5_z]


# -----------------------------------------------------------------------------
# Deterministic parameter init.  Per-layer weights are STACKED with a leading
# L axis (selected by BlockSpec index_map inside the fused encoder kernels).
# Matmul weights in bf16 (MXU operands), norms/biases in f32.
# -----------------------------------------------------------------------------
def _norm(key, shape, scale=0.02):
    return scale * jax.random.normal(key, shape, dtype=jnp.float32)


def init_clip_params(key):
    ks = jax.random.split(key, 8)
    L, D, FF = CLIP_LAYERS, CLIP_D, CLIP_FF
    wq = _norm(ks[2], (L, D, D))
    wk = _norm(ks[3], (L, D, D))
    wv = _norm(ks[4], (L, D, D))
    return dict(
        tok_emb=_norm(ks[0], (VOCAB, D)),
        pos_emb=_norm(ks[1], (MAX_LEN, D)),
        ln1_g=jnp.ones((L, 1, D), jnp.float32),
        ln1_b=jnp.zeros((L, 1, D), jnp.float32),
        wqkv=jnp.concatenate([wq, wk, wv], axis=-1).astype(jnp.bfloat16),
        bqkv=jnp.zeros((L, 1, 3 * D), jnp.float32),
        wo=_norm(ks[5], (L, D, D)).astype(jnp.bfloat16),
        bo=jnp.zeros((L, 1, D), jnp.float32),
        ln2_g=jnp.ones((L, 1, D), jnp.float32),
        ln2_b=jnp.zeros((L, 1, D), jnp.float32),
        w1=_norm(ks[6], (L, D, FF)).astype(jnp.bfloat16),
        b1=jnp.zeros((L, 1, FF), jnp.float32),
        w2=_norm(ks[7], (L, FF, D)).astype(jnp.bfloat16),
        b2=jnp.zeros((L, 1, D), jnp.float32),
        lnf_g=jnp.ones((1, D), jnp.float32),
        lnf_b=jnp.zeros((1, D), jnp.float32),
    )


def init_t5_params(key):
    ks = jax.random.split(key, 9)
    L, D, IN, FF = T5_LAYERS, T5_D, T5_INNER, T5_FF
    wq = _norm(ks[2], (L, D, IN))
    wk = _norm(ks[3], (L, D, IN))
    wv = _norm(ks[4], (L, D, IN))
    wi0 = _norm(ks[6], (L, D, FF))
    wi1 = _norm(ks[7], (L, D, FF))
    return dict(
        tok_emb=_norm(ks[0], (VOCAB, D)),
        rel_bias=_norm(ks[1], (T5_REL_BUCKETS, T5_H)),
        ln1_g=jnp.ones((L, 1, D), jnp.float32),
        wqkv=jnp.concatenate([wq, wk, wv], axis=-1).astype(jnp.bfloat16),
        wo=_norm(ks[5], (L, IN, D)).astype(jnp.bfloat16),
        ln2_g=jnp.ones((L, 1, D), jnp.float32),
        wi=jnp.concatenate([wi0, wi1], axis=-1).astype(jnp.bfloat16),
        wo_ff=_norm(ks[8], (L, FF, D)).astype(jnp.bfloat16),
        lnf_g=jnp.ones((1, D), jnp.float32),
    )


if __name__ == "__main__":
    root = jax.random.PRNGKey(0)
    k_tok, k_clip, k_t5 = jax.random.split(root, 3)

    # synthetic "tokenized text": (batch, max_length) int32 token ids
    tokens = jax.random.randint(k_tok, (BATCH, MAX_LEN), 0, VOCAB,
                                dtype=jnp.int32)

    clip_params = init_clip_params(k_clip)
    t5_params = init_t5_params(k_t5)

    fwd = jax.jit(frozen_clip_t5_encode)
    clip_z, t5_z = fwd(tokens, clip_params, t5_params)
    jax.block_until_ready(clip_z)
    jax.block_until_ready(t5_z)

    assert clip_z.shape == (BATCH, MAX_LEN, CLIP_D)
    assert t5_z.shape == (BATCH, MAX_LEN, T5_D)
    assert bool(jnp.all(jnp.isfinite(clip_z)))
    assert bool(jnp.all(jnp.isfinite(t5_z)))
    print("KERNEL_OK")
</pallas_src>

<mosaic_0001>
module attributes {stable_mosaic.version = 11 : i64} {
  func.func @_clip_stack_kernel(%arg0: i32, %arg1: memref<16x32xf32, #tpu.memory_space<vmem>>, %arg2: memref<1x1x32xf32, #tpu.memory_space<vmem>>, %arg3: memref<1x1x32xf32, #tpu.memory_space<vmem>>, %arg4: memref<1x32x96xbf16, #tpu.memory_space<vmem>>, %arg5: memref<1x1x96xf32, #tpu.memory_space<vmem>>, %arg6: memref<1x32x32xbf16, #tpu.memory_space<vmem>>, %arg7: memref<1x1x32xf32, #tpu.memory_space<vmem>>, %arg8: memref<1x1x32xf32, #tpu.memory_space<vmem>>, %arg9: memref<1x1x32xf32, #tpu.memory_space<vmem>>, %arg10: memref<1x32x64xbf16, #tpu.memory_space<vmem>>, %arg11: memref<1x1x64xf32, #tpu.memory_space<vmem>>, %arg12: memref<1x64x32xbf16, #tpu.memory_space<vmem>>, %arg13: memref<1x1x32xf32, #tpu.memory_space<vmem>>, %arg14: memref<1x32xf32, #tpu.memory_space<vmem>>, %arg15: memref<1x32xf32, #tpu.memory_space<vmem>>, %arg16: memref<16x32xf32, #tpu.memory_space<vmem>>, %arg17: memref<16x32xf32, #tpu.memory_space<vmem>>) attributes {dimension_semantics = [#tpu.dimension_semantics<arbitrary>], iteration_bounds = array<i64: 2>, scalar_prefetch = 0 : i64, scratch_operands = 1 : i64, tpu.core_type = #tpu.core_type<tc>, window_params = [{pipeline_mode = #tpu.pipeline_mode<synchronous>, transform_indices = @transform_0, window_bounds = array<i64: 16, 32>}, {transform_indices = @transform_1, window_bounds = array<i64: 1, 1, 32>}, {transform_indices = @transform_2, window_bounds = array<i64: 1, 1, 32>}, {transform_indices = @transform_3, window_bounds = array<i64: 1, 32, 96>}, {transform_indices = @transform_4, window_bounds = array<i64: 1, 1, 96>}, {transform_indices = @transform_5, window_bounds = array<i64: 1, 32, 32>}, {transform_indices = @transform_6, window_bounds = array<i64: 1, 1, 32>}, {transform_indices = @transform_7, window_bounds = array<i64: 1, 1, 32>}, {transform_indices = @transform_8, window_bounds = array<i64: 1, 1, 32>}, {transform_indices = @transform_9, window_bounds = array<i64: 1, 32, 64>}, {transform_indices = @transform_10, window_bounds = array<i64: 1, 1, 64>}, {transform_indices = @transform_11, window_bounds = array<i64: 1, 64, 32>}, {transform_indices = @transform_12, window_bounds = array<i64: 1, 1, 32>}, {pipeline_mode = #tpu.pipeline_mode<synchronous>, transform_indices = @transform_13, window_bounds = array<i64: 1, 32>}, {pipeline_mode = #tpu.pipeline_mode<synchronous>, transform_indices = @transform_14, window_bounds = array<i64: 1, 32>}, {pipeline_mode = #tpu.pipeline_mode<synchronous>, transform_indices = @transform_15, window_bounds = array<i64: 16, 32>}]} {
    %c0_i32 = arith.constant 0 : i32
    %0 = arith.cmpi eq, %arg0, %c0_i32 : i32
    %1 = arith.extui %0 : i1 to i32
    %c0_i32_0 = arith.constant 0 : i32
    %2 = arith.cmpi ne, %1, %c0_i32_0 : i32
    scf.if %2 {
      %c0_62 = arith.constant 0 : index
      %c0_63 = arith.constant 0 : index
      %165 = vector.load %arg1[%c0_62, %c0_63] : memref<16x32xf32, #tpu.memory_space<vmem>>, vector<16x32xf32>
      %c0_64 = arith.constant 0 : index
      %c0_65 = arith.constant 0 : index
      %166 = vector.load %arg17[%c0_64, %c0_65] : memref<16x32xf32, #tpu.memory_space<vmem>>, vector<16x32xf32>
      tpu.vector_store %arg17[%c0_64, %c0_65], %165 {strides = array<i32>} : memref<16x32xf32, #tpu.memory_space<vmem>>, vector<16x32xf32>,
    } else {
    }
    %c0 = arith.constant 0 : index
    %c0_1 = arith.constant 0 : index
    %3 = vector.load %arg17[%c0, %c0_1] : memref<16x32xf32, #tpu.memory_space<vmem>>, vector<16x32xf32>
    %c0_2 = arith.constant 0 : index
    %c0_3 = arith.constant 0 : index
    %c0_4 = arith.constant 0 : index
    %4 = vector.load %arg2[%c0_2, %c0_3, %c0_4] : memref<1x1x32xf32, #tpu.memory_space<vmem>>, vector<1x1x32xf32>
    %5 = vector.shape_cast %4 : vector<1x1x32xf32> to vector<1x32xf32>
    %c0_5 = arith.constant 0 : index
    %c0_6 = arith.constant 0 : index
    %c0_7 = arith.constant 0 : index
    %6 = vector.load %arg3[%c0_5, %c0_6, %c0_7] : memref<1x1x32xf32, #tpu.memory_space<vmem>>, vector<1x1x32xf32>
    %7 = vector.shape_cast %6 : vector<1x1x32xf32> to vector<1x32xf32>
    %cst = arith.constant dense<0.000000e+00> : vector<16xf32>
    %8 = vector.multi_reduction <add>, %3, %cst [1] : vector<16x32xf32> to vector<16xf32>
    %9 = vector.shape_cast %8 : vector<16xf32> to vector<16x1xf32>
    %cst_8 = arith.constant 3.200000e+01 : f32
    %10 = vector.broadcast %cst_8 : f32 to vector<16x1xf32>
    %11 = arith.divf %9, %10 : vector<16x1xf32>
    %12 = vector.broadcast %11 : vector<16x1xf32> to vector<16x32xf32>
    %13 = arith.subf %3, %12 : vector<16x32xf32>
    %14 = vector.broadcast %11 : vector<16x1xf32> to vector<16x32xf32>
    %15 = arith.subf %3, %14 : vector<16x32xf32>
    %16 = arith.mulf %13, %15 : vector<16x32xf32>
    %cst_9 = arith.constant dense<0.000000e+00> : vector<16xf32>
    %17 = vector.multi_reduction <add>, %16, %cst_9 [1] : vector<16x32xf32> to vector<16xf32>
    %18 = vector.shape_cast %17 : vector<16xf32> to vector<16x1xf32>
    %cst_10 = arith.constant 3.200000e+01 : f32
    %19 = vector.broadcast %cst_10 : f32 to vector<16x1xf32>
    %20 = arith.divf %18, %19 : vector<16x1xf32>
    %21 = vector.broadcast %11 : vector<16x1xf32> to vector<16x32xf32>
    %22 = arith.subf %3, %21 : vector<16x32xf32>
    %cst_11 = arith.constant 9.99999974E-6 : f32
    %23 = vector.broadcast %cst_11 : f32 to vector<16x1xf32>
    %24 = arith.addf %20, %23 : vector<16x1xf32>
    %25 = math.rsqrt %24 : vector<16x1xf32>
    %26 = vector.broadcast %25 : vector<16x1xf32> to vector<16x32xf32>
    %27 = arith.mulf %22, %26 : vector<16x32xf32>
    %28 = vector.broadcast %5 : vector<1x32xf32> to vector<16x32xf32>
    %29 = arith.mulf %27, %28 : vector<16x32xf32>
    %30 = vector.broadcast %7 : vector<1x32xf32> to vector<16x32xf32>
    %31 = arith.addf %29, %30 : vector<16x32xf32>
    %32 = arith.truncf %31 : vector<16x32xf32> to vector<16x32xbf16>
    %c0_12 = arith.constant 0 : index
    %c0_13 = arith.constant 0 : index
    %c0_14 = arith.constant 0 : index
    %33 = vector.load %arg4[%c0_12, %c0_13, %c0_14] : memref<1x32x96xbf16, #tpu.memory_space<vmem>>, vector<1x32x96xbf16>
    %34 = vector.shape_cast %33 : vector<1x32x96xbf16> to vector<32x96xbf16>
    %cst_15 = arith.constant dense<0.000000e+00> : vector<16x96xf32>
    %35 = tpu.matmul %32, %34, %cst_15 {dimension_numbers = #tpu.dot_dimension_numbers<[1], [0], [0], [1], [0, 0, 1, 1], [], []>} : vector<16x32xbf16>, vector<32x96xbf16>, vector<16x96xf32> -> vector<16x96xf32>
    %c0_16 = arith.constant 0 : index
    %c0_17 = arith.constant 0 : index
    %c0_18 = arith.constant 0 : index
    %36 = vector.load %arg5[%c0_16, %c0_17, %c0_18] : memref<1x1x96xf32, #tpu.memory_space<vmem>>, vector<1x1x96xf32>
    %37 = vector.shape_cast %36 : vector<1x1x96xf32> to vector<1x96xf32>
    %38 = vector.broadcast %37 : vector<1x96xf32> to vector<16x96xf32>
    %39 = arith.addf %35, %38 : vector<16x96xf32>
    %40 = vector.extract_strided_slice %39 {offsets = [0, 0], sizes = [16, 8], strides = [1, 1]} : vector<16x96xf32> to vector<16x8xf32>
    %41 = vector.shape_cast %40 : vector<16x8xf32> to vector<2x8x8xf32>
    %42 = vector.extract_strided_slice %39 {offsets = [0, 8], sizes = [16, 8], strides = [1, 1]} : vector<16x96xf32> to vector<16x8xf32>
    %43 = vector.shape_cast %42 : vector<16x8xf32> to vector<2x8x8xf32>
    %44 = vector.extract_strided_slice %39 {offsets = [0, 16], sizes = [16, 8], strides = [1, 1]} : vector<16x96xf32> to vector<16x8xf32>
    %45 = vector.shape_cast %44 : vector<16x8xf32> to vector<2x8x8xf32>
    %46 = vector.extract_strided_slice %39 {offsets = [0, 24], sizes = [16, 8], strides = [1, 1]} : vector<16x96xf32> to vector<16x8xf32>
    %47 = vector.shape_cast %46 : vector<16x8xf32> to vector<2x8x8xf32>
    %48 = tpu.concatenate %41, %43, %45, %47 in 0 : vector<2x8x8xf32>, vector<2x8x8xf32>, vector<2x8x8xf32>, vector<2x8x8xf32> -> vector<8x8x8xf32>
    %cst_19 = arith.constant 0.353553385 : f32
    %49 = vector.broadcast %cst_19 : f32 to vector<8x8x8xf32>
    %50 = arith.mulf %48, %49 : vector<8x8x8xf32>
    %51 = vector.extract_strided_slice %39 {offsets = [0, 32], sizes = [16, 8], strides = [1, 1]} : vector<16x96xf32> to vector<16x8xf32>
    %52 = vector.shape_cast %51 : vector<16x8xf32> to vector<2x8x8xf32>
    %53 = vector.extract_strided_slice %39 {offsets = [0, 40], sizes = [16, 8], strides = [1, 1]} : vector<16x96xf32> to vector<16x8xf32>
    %54 = vector.shape_cast %53 : vector<16x8xf32> to vector<2x8x8xf32>
    %55 = vector.extract_strided_slice %39 {offsets = [0, 48], sizes = [16, 8], strides = [1, 1]} : vector<16x96xf32> to vector<16x8xf32>
    %56 = vector.shape_cast %55 : vector<16x8xf32> to vector<2x8x8xf32>
    %57 = vector.extract_strided_slice %39 {offsets = [0, 56], sizes = [16, 8], strides = [1, 1]} : vector<16x96xf32> to vector<16x8xf32>
    %58 = vector.shape_cast %57 : vector<16x8xf32> to vector<2x8x8xf32>
    %59 = tpu.concatenate %52, %54, %56, %58 in 0 : vector<2x8x8xf32>, vector<2x8x8xf32>, vector<2x8x8xf32>, vector<2x8x8xf32> -> vector<8x8x8xf32>
    %60 = vector.extract_strided_slice %39 {offsets = [0, 64], sizes = [16, 8], strides = [1, 1]} : vector<16x96xf32> to vector<16x8xf32>
    %61 = vector.shape_cast %60 : vector<16x8xf32> to vector<2x8x8xf32>
    %62 = vector.extract_strided_slice %39 {offsets = [0, 72], sizes = [16, 8], strides = [1, 1]} : vector<16x96xf32> to vector<16x8xf32>
    %63 = vector.shape_cast %62 : vector<16x8xf32> to vector<2x8x8xf32>
    %64 = vector.extract_strided_slice %39 {offsets = [0, 80], sizes = [16, 8], strides = [1, 1]} : vector<16x96xf32> to vector<16x8xf32>
    %65 = vector.shape_cast %64 : vector<16x8xf32> to vector<2x8x8xf32>
    %66 = vector.extract_strided_slice %39 {offsets = [0, 88], sizes = [16, 8], strides = [1, 1]} : vector<16x96xf32> to vector<16x8xf32>
    %67 = vector.shape_cast %66 : vector<16x8xf32> to vector<2x8x8xf32>
    %68 = tpu.concatenate %61, %63, %65, %67 in 0 : vector<2x8x8xf32>, vector<2x8x8xf32>, vector<2x8x8xf32>, vector<2x8x8xf32> -> vector<8x8x8xf32>
    %69 = tpu.iota {dimensions = array<i32: 0>} : vector<8x8xi32>
    %70 = tpu.iota {dimensions = array<i32: 1>} : vector<8x8xi32>
    %71 = arith.cmpi sle, %70, %69 : vector<8x8xi32>
    %72 = vector.shape_cast %71 : vector<8x8xi1> to vector<1x8x8xi1>
    %73 = arith.truncf %50 : vector<8x8x8xf32> to vector<8x8x8xbf16>
    %74 = arith.truncf %59 : vector<8x8x8xf32> to vector<8x8x8xbf16>
    "tpu.trace_start"() <{level = 10 : i32, message = "bqd,bkd->bqk"}> : () -> ()
    %cst_20 = arith.constant dense<0.000000e+00> : vector<8x8x8xf32>
    %75 = tpu.matmul %73, %74, %cst_20 {dimension_numbers = #tpu.dot_dimension_numbers<[2], [2], [1], [1], [0, 0, 0, 1, 1, 1], [0], [0]>} : vector<8x8x8xbf16>, vector<8x8x8xbf16>, vector<8x8x8xf32> -> vector<8x8x8xf32>
    %cst_21 = arith.constant -1.000000e+09 : f32
    "tpu.trace_stop"() : () -> ()
    %76 = vector.shape_cast %72 : vector<1x8x8xi1> to vector<1x8x8xi1>
    %77 = vector.broadcast %76 : vector<1x8x8xi1> to vector<8x8x8xi1>
    %78 = vector.broadcast %cst_21 : f32 to vector<8x8x8xf32>
    %79 = arith.select %77, %75, %78 : vector<8x8x8xi1>, vector<8x8x8xf32>
    %cst_22 = arith.constant dense<0xFF800000> : vector<8x8xf32>
    %80 = vector.multi_reduction <maximumf>, %79, %cst_22 [2] : vector<8x8x8xf32> to vector<8x8xf32>
    %81 = vector.shape_cast %80 : vector<8x8xf32> to vector<8x8x1xf32>
    %82 = vector.broadcast %81 : vector<8x8x1xf32> to vector<8x8x8xf32>
    %83 = arith.subf %79, %82 : vector<8x8x8xf32>
    %84 = math.exp %83 : vector<8x8x8xf32>
    %cst_23 = arith.constant dense<0.000000e+00> : vector<8x8xf32>
    %85 = vector.multi_reduction <add>, %84, %cst_23 [2] : vector<8x8x8xf32> to vector<8x8xf32>
    %86 = vector.shape_cast %85 : vector<8x8xf32> to vector<8x8x1xf32>
    %87 = tpu.reciprocal %86 {approx = true} : vector<8x8x1xf32> -> vector<8x8x1xf32>
    %88 = vector.broadcast %87 : vector<8x8x1xf32> to vector<8x8x8xf32>
    %89 = arith.mulf %84, %88 : vector<8x8x8xf32>
    %90 = arith.truncf %89 : vector<8x8x8xf32> to vector<8x8x8xbf16>
    %91 = arith.truncf %68 : vector<8x8x8xf32> to vector<8x8x8xbf16>
    "tpu.trace_start"() <{level = 10 : i32, message = "bqk,bkd->bqd"}> : () -> ()
    %cst_24 = arith.constant dense<0.000000e+00> : vector<8x8x8xf32>
    %92 = tpu.matmul %90, %91, %cst_24 {dimension_numbers = #tpu.dot_dimension_numbers<[2], [1], [1], [2], [0, 0, 0, 1, 1, 2], [0], [0]>} : vector<8x8x8xbf16>, vector<8x8x8xbf16>, vector<8x8x8xf32> -> vector<8x8x8xf32>
    "tpu.trace_stop"() : () -> ()
    %93 = vector.extract_strided_slice %92 {offsets = [0, 0, 0], sizes = [2, 8, 8], strides = [1, 1, 1]} : vector<8x8x8xf32> to vector<2x8x8xf32>
    %94 = vector.extract_strided_slice %92 {offsets = [2, 0, 0], sizes = [2, 8, 8], strides = [1, 1, 1]} : vector<8x8x8xf32> to vector<2x8x8xf32>
    %95 = vector.extract_strided_slice %92 {offsets = [4, 0, 0], sizes = [2, 8, 8], strides = [1, 1, 1]} : vector<8x8x8xf32> to vector<2x8x8xf32>
    %96 = vector.extract_strided_slice %92 {offsets = [6, 0, 0], sizes = [2, 8, 8], strides = [1, 1, 1]} : vector<8x8x8xf32> to vector<2x8x8xf32>
    %97 = tpu.concatenate %93, %94, %95, %96 in 2 : vector<2x8x8xf32>, vector<2x8x8xf32>, vector<2x8x8xf32>, vector<2x8x8xf32> -> vector<2x8x32xf32>
    %98 = vector.shape_cast %97 : vector<2x8x32xf32> to vector<16x32xf32>
    %99 = arith.truncf %98 : vector<16x32xf32> to vector<16x32xbf16>
    %c0_25 = arith.constant 0 : index
    %c0_26 = arith.constant 0 : index
    %c0_27 = arith.constant 0 : index
    %100 = vector.load %arg6[%c0_25, %c0_26, %c0_27] : memref<1x32x32xbf16, #tpu.memory_space<vmem>>, vector<1x32x32xbf16>
    %101 = vector.shape_cast %100 : vector<1x32x32xbf16> to vector<32x32xbf16>
    %cst_28 = arith.constant dense<0.000000e+00> : vector<16x32xf32>
    %102 = tpu.matmul %99, %101, %cst_28 {dimension_numbers = #tpu.dot_dimension_numbers<[1], [0], [0], [1], [0, 0, 1, 1], [], []>} : vector<16x32xbf16>, vector<32x32xbf16>, vector<16x32xf32> -> vector<16x32xf32>
    %103 = arith.addf %3, %102 : vector<16x32xf32>
    %c0_29 = arith.constant 0 : index
    %c0_30 = arith.constant 0 : index
    %c0_31 = arith.constant 0 : index
    %104 = vector.load %arg7[%c0_29, %c0_30, %c0_31] : memref<1x1x32xf32, #tpu.memory_space<vmem>>, vector<1x1x32xf32>
    %105 = vector.shape_cast %104 : vector<1x1x32xf32> to vector<1x32xf32>
    %106 = vector.broadcast %105 : vector<1x32xf32> to vector<16x32xf32>
    %107 = arith.addf %103, %106 : vector<16x32xf32>
    %c0_32 = arith.constant 0 : index
    %c0_33 = arith.constant 0 : index
    %c0_34 = arith.constant 0 : index
    %108 = vector.load %arg8[%c0_32, %c0_33, %c0_34] : memref<1x1x32xf32, #tpu.memory_space<vmem>>, vector<1x1x32xf32>
    %109 = vector.shape_cast %108 : vector<1x1x32xf32> to vector<1x32xf32>
    %c0_35 = arith.constant 0 : index
    %c0_36 = arith.constant 0 : index
    %c0_37 = arith.constant 0 : index
    %110 = vector.load %arg9[%c0_35, %c0_36, %c0_37] : memref<1x1x32xf32, #tpu.memory_space<vmem>>, vector<1x1x32xf32>
    %111 = vector.shape_cast %110 : vector<1x1x32xf32> to vector<1x32xf32>
    %cst_38 = arith.constant dense<0.000000e+00> : vector<16xf32>
    %112 = vector.multi_reduction <add>, %107, %cst_38 [1] : vector<16x32xf32> to vector<16xf32>
    %113 = vector.shape_cast %112 : vector<16xf32> to vector<16x1xf32>
    %cst_39 = arith.constant 3.200000e+01 : f32
    %114 = vector.broadcast %cst_39 : f32 to vector<16x1xf32>
    %115 = arith.divf %113, %114 : vector<16x1xf32>
    %116 = vector.broadcast %115 : vector<16x1xf32> to vector<16x32xf32>
    %117 = arith.subf %107, %116 : vector<16x32xf32>
    %118 = vector.broadcast %115 : vector<16x1xf32> to vector<16x32xf32>
    %119 = arith.subf %107, %118 : vector<16x32xf32>
    %120 = arith.mulf %117, %119 : vector<16x32xf32>
    %cst_40 = arith.constant dense<0.000000e+00> : vector<16xf32>
    %121 = vector.multi_reduction <add>, %120, %cst_40 [1] : vector<16x32xf32> to vector<16xf32>
    %122 = vector.shape_cast %121 : vector<16xf32> to vector<16x1xf32>
    %cst_41 = arith.constant 3.200000e+01 : f32
    %123 = vector.broadcast %cst_41 : f32 to vector<16x1xf32>
    %124 = arith.divf %122, %123 : vector<16x1xf32>
    %125 = vector.broadcast %115 : vector<16x1xf32> to vector<16x32xf32>
    %126 = arith.subf %107, %125 : vector<16x32xf32>
    %cst_42 = arith.constant 9.99999974E-6 : f32
    %127 = vector.broadcast %cst_42 : f32 to vector<16x1xf32>
    %128 = arith.addf %124, %127 : vector<16x1xf32>
    %129 = math.rsqrt %128 : vector<16x1xf32>
    %130 = vector.broadcast %129 : vector<16x1xf32> to vector<16x32xf32>
    %131 = arith.mulf %126, %130 : vector<16x32xf32>
    %132 = vector.broadcast %109 : vector<1x32xf32> to vector<16x32xf32>
    %133 = arith.mulf %131, %132 : vector<16x32xf32>
    %134 = vector.broadcast %111 : vector<1x32xf32> to vector<16x32xf32>
    %135 = arith.addf %133, %134 : vector<16x32xf32>
    %136 = arith.truncf %135 : vector<16x32xf32> to vector<16x32xbf16>
    %c0_43 = arith.constant 0 : index
    %c0_44 = arith.constant 0 : index
    %c0_45 = arith.constant 0 : index
    %137 = vector.load %arg10[%c0_43, %c0_44, %c0_45] : memref<1x32x64xbf16, #tpu.memory_space<vmem>>, vector<1x32x64xbf16>
    %138 = vector.shape_cast %137 : vector<1x32x64xbf16> to vector<32x64xbf16>
    %cst_46 = arith.constant dense<0.000000e+00> : vector<16x64xf32>
    %139 = tpu.matmul %136, %138, %cst_46 {dimension_numbers = #tpu.dot_dimension_numbers<[1], [0], [0], [1], [0, 0, 1, 1], [], []>} : vector<16x32xbf16>, vector<32x64xbf16>, vector<16x64xf32> -> vector<16x64xf32>
    %c0_47 = arith.constant 0 : index
    %c0_48 = arith.constant 0 : index
    %c0_49 = arith.constant 0 : index
    %140 = vector.load %arg11[%c0_47, %c0_48, %c0_49] : memref<1x1x64xf32, #tpu.memory_space<vmem>>, vector<1x1x64xf32>
    %141 = vector.shape_cast %140 : vector<1x1x64xf32> to vector<1x64xf32>
    %142 = vector.broadcast %141 : vector<1x64xf32> to vector<16x64xf32>
    %143 = arith.addf %139, %142 : vector<16x64xf32>
    %cst_50 = arith.constant 1.702000e+00 : f32
    %144 = vector.broadcast %cst_50 : f32 to vector<16x64xf32>
    %145 = arith.mulf %144, %143 : vector<16x64xf32>
    %146 = arith.negf %145 : vector<16x64xf32>
    %147 = math.exp %146 : vector<16x64xf32>
    %cst_51 = arith.constant 1.000000e+00 : f32
    %148 = vector.broadcast %cst_51 : f32 to vector<16x64xf32>
    %149 = arith.addf %148, %147 : vector<16x64xf32>
    %150 = arith.divf %148, %149 : vector<16x64xf32>
    %151 = arith.mulf %143, %150 : vector<16x64xf32>
    %152 = arith.truncf %151 : vector<16x64xf32> to vector<16x64xbf16>
    %c0_52 = arith.constant 0 : index
    %c0_53 = arith.constant 0 : index
    %c0_54 = arith.constant 0 : index
    %153 = vector.load %arg12[%c0_52, %c0_53, %c0_54] : memref<1x64x32xbf16, #tpu.memory_space<vmem>>, vector<1x64x32xbf16>
    %154 = vector.shape_cast %153 : vector<1x64x32xbf16> to vector<64x32xbf16>
    %cst_55 = arith.constant dense<0.000000e+00> : vector<16x32xf32>
    %155 = tpu.matmul %152, %154, %cst_55 {dimension_numbers = #tpu.dot_dimension_numbers<[1], [0], [0], [1], [0, 0, 1, 1], [], []>} : vector<16x64xbf16>, vector<64x32xbf16>, vector<16x32xf32> -> vector<16x32xf32>
    %c0_56 = arith.constant 0 : index
    %c0_57 = arith.constant 0 : index
    %c0_58 = arith.constant 0 : index
    %156 = vector.load %arg13[%c0_56, %c0_57, %c0_58] : memref<1x1x32xf32, #tpu.memory_space<vmem>>, vector<1x1x32xf32>
    %157 = vector.shape_cast %156 : vector<1x1x32xf32> to vector<1x32xf32>
    %158 = vector.broadcast %157 : vector<1x32xf32> to vector<16x32xf32>
    %159 = arith.addf %155, %158 : vector<16x32xf32>
    %160 = arith.addf %107, %159 : vector<16x32xf32>
    %c0_59 = arith.constant 0 : index
    %c0_60 = arith.constant 0 : index
    %161 = vector.load %arg17[%c0_59, %c0_60] : memref<16x32xf32, #tpu.memory_space<vmem>>, vector<16x32xf32>
    tpu.vector_store %arg17[%c0_59, %c0_60], %160 {strides = array<i32>} : memref<16x32xf32, #tpu.memory_space<vmem>>, vector<16x32xf32>,
    %c1_i32 = arith.constant 1 : i32
    %162 = arith.cmpi eq, %arg0, %c1_i32 : i32
    %163 = arith.extui %162 : i1 to i32
    %c0_i32_61 = arith.constant 0 : i32
    %164 = arith.cmpi ne, %163, %c0_i32_61 : i32
    scf.if %164 {
      %c0_62 = arith.constant 0 : index
      %c0_63 = arith.constant 0 : index
      %165 = vector.load %arg14[%c0_62, %c0_63] : memref<1x32xf32, #tpu.memory_space<vmem>>, vector<1x32xf32>
      %c0_64 = arith.constant 0 : index
      %c0_65 = arith.constant 0 : index
      %166 = vector.load %arg15[%c0_64, %c0_65] : memref<1x32xf32, #tpu.memory_space<vmem>>, vector<1x32xf32>
      %cst_66 = arith.constant dense<0.000000e+00> : vector<16xf32>
      %167 = vector.multi_reduction <add>, %160, %cst_66 [1] : vector<16x32xf32> to vector<16xf32>
      %168 = vector.shape_cast %167 : vector<16xf32> to vector<16x1xf32>
      %cst_67 = arith.constant 3.200000e+01 : f32
      %169 = vector.broadcast %cst_67 : f32 to vector<16x1xf32>
      %170 = arith.divf %168, %169 : vector<16x1xf32>
      %171 = vector.broadcast %170 : vector<16x1xf32> to vector<16x32xf32>
      %172 = arith.subf %160, %171 : vector<16x32xf32>
      %173 = vector.broadcast %170 : vector<16x1xf32> to vector<16x32xf32>
      %174 = arith.subf %160, %173 : vector<16x32xf32>
      %175 = arith.mulf %172, %174 : vector<16x32xf32>
      %cst_68 = arith.constant dense<0.000000e+00> : vector<16xf32>
      %176 = vector.multi_reduction <add>, %175, %cst_68 [1] : vector<16x32xf32> to vector<16xf32>
      %177 = vector.shape_cast %176 : vector<16xf32> to vector<16x1xf32>
      %cst_69 = arith.constant 3.200000e+01 : f32
      %178 = vector.broadcast %cst_69 : f32 to vector<16x1xf32>
      %179 = arith.divf %177, %178 : vector<16x1xf32>
      %180 = vector.broadcast %170 : vector<16x1xf32> to vector<16x32xf32>
      %181 = arith.subf %160, %180 : vector<16x32xf32>
      %cst_70 = arith.constant 9.99999974E-6 : f32
      %182 = vector.broadcast %cst_70 : f32 to vector<16x1xf32>
      %183 = arith.addf %179, %182 : vector<16x1xf32>
      %184 = math.rsqrt %183 : vector<16x1xf32>
      %185 = vector.broadcast %184 : vector<16x1xf32> to vector<16x32xf32>
      %186 = arith.mulf %181, %185 : vector<16x32xf32>
      %187 = vector.broadcast %165 : vector<1x32xf32> to vector<16x32xf32>
      %188 = arith.mulf %186, %187 : vector<16x32xf32>
      %189 = vector.broadcast %166 : vector<1x32xf32> to vector<16x32xf32>
      %190 = arith.addf %188, %189 : vector<16x32xf32>
      %c0_71 = arith.constant 0 : index
      %c0_72 = arith.constant 0 : index
      %191 = vector.load %arg16[%c0_71, %c0_72] : memref<16x32xf32, #tpu.memory_space<vmem>>, vector<16x32xf32>
      tpu.vector_store %arg16[%c0_71, %c0_72], %190 {strides = array<i32>} : memref<16x32xf32, #tpu.memory_space<vmem>>, vector<16x32xf32>,
    } else {
    }
    return
  }
  func.func @transform_0(%arg0: i32) -> (i32, i32) {
    %c0_i32 = arith.constant 0 : i32
    %c0_i32_0 = arith.constant 0 : i32
    %c0_i32_1 = arith.constant 0 : i32
    return %c0_i32, %c0_i32_0 : i32, i32
  }
  func.func @transform_1(%arg0: i32) -> (i32, i32, i32) {
    %c0_i32 = arith.constant 0 : i32
    %c0_i32_0 = arith.constant 0 : i32
    %c0_i32_1 = arith.constant 0 : i32
    return %arg0, %c0_i32, %c0_i32_0 : i32, i32, i32
  }
  func.func @transform_2(%arg0: i32) -> (i32, i32, i32) {
    %c0_i32 = arith.constant 0 : i32
    %c0_i32_0 = arith.constant 0 : i32
    %c0_i32_1 = arith.constant 0 : i32
    return %arg0, %c0_i32, %c0_i32_0 : i32, i32, i32
  }
  func.func @transform_3(%arg0: i32) -> (i32, i32, i32) {
    %c0_i32 = arith.constant 0 : i32
    %c0_i32_0 = arith.constant 0 : i32
    %c0_i32_1 = arith.constant 0 : i32
    return %arg0, %c0_i32, %c0_i32_0 : i32, i32, i32
  }
  func.func @transform_4(%arg0: i32) -> (i32, i32, i32) {
    %c0_i32 = arith.constant 0 : i32
    %c0_i32_0 = arith.constant 0 : i32
    %c0_i32_1 = arith.constant 0 : i32
    return %arg0, %c0_i32, %c0_i32_0 : i32, i32, i32
  }
  func.func @transform_5(%arg0: i32) -> (i32, i32, i32) {
    %c0_i32 = arith.constant 0 : i32
    %c0_i32_0 = arith.constant 0 : i32
    %c0_i32_1 = arith.constant 0 : i32
    return %arg0, %c0_i32, %c0_i32_0 : i32, i32, i32
  }
  func.func @transform_6(%arg0: i32) -> (i32, i32, i32) {
    %c0_i32 = arith.constant 0 : i32
    %c0_i32_0 = arith.constant 0 : i32
    %c0_i32_1 = arith.constant 0 : i32
    return %arg0, %c0_i32, %c0_i32_0 : i32, i32, i32
  }
  func.func @transform_7(%arg0: i32) -> (i32, i32, i32) {
    %c0_i32 = arith.constant 0 : i32
    %c0_i32_0 = arith.constant 0 : i32
    %c0_i32_1 = arith.constant 0 : i32
    return %arg0, %c0_i32, %c0_i32_0 : i32, i32, i32
  }
  func.func @transform_8(%arg0: i32) -> (i32, i32, i32) {
    %c0_i32 = arith.constant 0 : i32
    %c0_i32_0 = arith.constant 0 : i32
    %c0_i32_1 = arith.constant 0 : i32
    return %arg0, %c0_i32, %c0_i32_0 : i32, i32, i32
  }
  func.func @transform_9(%arg0: i32) -> (i32, i32, i32) {
    %c0_i32 = arith.constant 0 : i32
    %c0_i32_0 = arith.constant 0 : i32
    %c0_i32_1 = arith.constant 0 : i32
    return %arg0, %c0_i32, %c0_i32_0 : i32, i32, i32
  }
  func.func @transform_10(%arg0: i32) -> (i32, i32, i32) {
    %c0_i32 = arith.constant 0 : i32
    %c0_i32_0 = arith.constant 0 : i32
    %c0_i32_1 = arith.constant 0 : i32
    return %arg0, %c0_i32, %c0_i32_0 : i32, i32, i32
  }
  func.func @transform_11(%arg0: i32) -> (i32, i32, i32) {
    %c0_i32 = arith.constant 0 : i32
    %c0_i32_0 = arith.constant 0 : i32
    %c0_i32_1 = arith.constant 0 : i32
    return %arg0, %c0_i32, %c0_i32_0 : i32, i32, i32
  }
  func.func @transform_12(%arg0: i32) -> (i32, i32, i32) {
    %c0_i32 = arith.constant 0 : i32
    %c0_i32_0 = arith.constant 0 : i32
    %c0_i32_1 = arith.constant 0 : i32
    return %arg0, %c0_i32, %c0_i32_0 : i32, i32, i32
  }
  func.func @transform_13(%arg0: i32) -> (i32, i32) {
    %c0_i32 = arith.constant 0 : i32
    %c0_i32_0 = arith.constant 0 : i32
    %c0_i32_1 = arith.constant 0 : i32
    return %c0_i32, %c0_i32_0 : i32, i32
  }
  func.func @transform_14(%arg0: i32) -> (i32, i32) {
    %c0_i32 = arith.constant 0 : i32
    %c0_i32_0 = arith.constant 0 : i32
    %c0_i32_1 = arith.constant 0 : i32
    return %c0_i32, %c0_i32_0 : i32, i32
  }
  func.func @transform_15(%arg0: i32) -> (i32, i32) {
    %c0_i32 = arith.constant 0 : i32
    %c0_i32_0 = arith.constant 0 : i32
    %c0_i32_1 = arith.constant 0 : i32
    return %c0_i32, %c0_i32_0 : i32, i32
  }
}

module attributes {stable_mosaic.version = 11 : i64} {
  func.func @_t5_stack_kernel(%arg0: i32, %arg1: memref<16x32xf32, #tpu.memory_space<vmem>>, %arg2: memref<8x8x8xf32, #tpu.memory_space<vmem>>, %arg3: memref<1x1x32xf32, #tpu.memory_space<vmem>>, %arg4: memref<1x32x96xbf16, #tpu.memory_space<vmem>>, %arg5: memref<1x32x32xbf16, #tpu.memory_space<vmem>>, %arg6: memref<1x1x32xf32, #tpu.memory_space<vmem>>, %arg7: memref<1x32x128xbf16, #tpu.memory_space<vmem>>, %arg8: memref<1x64x32xbf16, #tpu.memory_space<vmem>>, %arg9: memref<1x32xf32, #tpu.memory_space<vmem>>, %arg10: memref<16x32xf32, #tpu.memory_space<vmem>>, %arg11: memref<16x32xf32, #tpu.memory_space<vmem>>) attributes {dimension_semantics = [#tpu.dimension_semantics<arbitrary>], iteration_bounds = array<i64: 2>, scalar_prefetch = 0 : i64, scratch_operands = 1 : i64, tpu.core_type = #tpu.core_type<tc>, window_params = [{pipeline_mode = #tpu.pipeline_mode<synchronous>, transform_indices = @transform_0, window_bounds = array<i64: 16, 32>}, {pipeline_mode = #tpu.pipeline_mode<synchronous>, transform_indices = @transform_1, window_bounds = array<i64: 8, 8, 8>}, {transform_indices = @transform_2, window_bounds = array<i64: 1, 1, 32>}, {transform_indices = @transform_3, window_bounds = array<i64: 1, 32, 96>}, {transform_indices = @transform_4, window_bounds = array<i64: 1, 32, 32>}, {transform_indices = @transform_5, window_bounds = array<i64: 1, 1, 32>}, {transform_indices = @transform_6, window_bounds = array<i64: 1, 32, 128>}, {transform_indices = @transform_7, window_bounds = array<i64: 1, 64, 32>}, {pipeline_mode = #tpu.pipeline_mode<synchronous>, transform_indices = @transform_8, window_bounds = array<i64: 1, 32>}, {pipeline_mode = #tpu.pipeline_mode<synchronous>, transform_indices = @transform_9, window_bounds = array<i64: 16, 32>}]} {
    %c0_i32 = arith.constant 0 : i32
    %0 = arith.cmpi eq, %arg0, %c0_i32 : i32
    %1 = arith.extui %0 : i1 to i32
    %c0_i32_0 = arith.constant 0 : i32
    %2 = arith.cmpi ne, %1, %c0_i32_0 : i32
    scf.if %2 {
      %c0_43 = arith.constant 0 : index
      %c0_44 = arith.constant 0 : index
      %121 = vector.load %arg1[%c0_43, %c0_44] : memref<16x32xf32, #tpu.memory_space<vmem>>, vector<16x32xf32>
      %c0_45 = arith.constant 0 : index
      %c0_46 = arith.constant 0 : index
      %122 = vector.load %arg11[%c0_45, %c0_46] : memref<16x32xf32, #tpu.memory_space<vmem>>, vector<16x32xf32>
      tpu.vector_store %arg11[%c0_45, %c0_46], %121 {strides = array<i32>} : memref<16x32xf32, #tpu.memory_space<vmem>>, vector<16x32xf32>,
    } else {
    }
    %c0 = arith.constant 0 : index
    %c0_1 = arith.constant 0 : index
    %3 = vector.load %arg11[%c0, %c0_1] : memref<16x32xf32, #tpu.memory_space<vmem>>, vector<16x32xf32>
    %c0_2 = arith.constant 0 : index
    %c0_3 = arith.constant 0 : index
    %c0_4 = arith.constant 0 : index
    %4 = vector.load %arg3[%c0_2, %c0_3, %c0_4] : memref<1x1x32xf32, #tpu.memory_space<vmem>>, vector<1x1x32xf32>
    %5 = vector.shape_cast %4 : vector<1x1x32xf32> to vector<1x32xf32>
    %6 = arith.mulf %3, %3 : vector<16x32xf32>
    %cst = arith.constant dense<0.000000e+00> : vector<16xf32>
    %7 = vector.multi_reduction <add>, %6, %cst [1] : vector<16x32xf32> to vector<16xf32>
    %8 = vector.shape_cast %7 : vector<16xf32> to vector<16x1xf32>
    %cst_5 = arith.constant 3.200000e+01 : f32
    %9 = vector.broadcast %cst_5 : f32 to vector<16x1xf32>
    %10 = arith.divf %8, %9 : vector<16x1xf32>
    %cst_6 = arith.constant 9.99999997E-7 : f32
    %11 = vector.broadcast %cst_6 : f32 to vector<16x1xf32>
    %12 = arith.addf %10, %11 : vector<16x1xf32>
    %13 = math.rsqrt %12 : vector<16x1xf32>
    %14 = vector.broadcast %13 : vector<16x1xf32> to vector<16x32xf32>
    %15 = arith.mulf %3, %14 : vector<16x32xf32>
    %16 = vector.broadcast %5 : vector<1x32xf32> to vector<16x32xf32>
    %17 = arith.mulf %15, %16 : vector<16x32xf32>
    %18 = arith.truncf %17 : vector<16x32xf32> to vector<16x32xbf16>
    %c0_7 = arith.constant 0 : index
    %c0_8 = arith.constant 0 : index
    %c0_9 = arith.constant 0 : index
    %19 = vector.load %arg4[%c0_7, %c0_8, %c0_9] : memref<1x32x96xbf16, #tpu.memory_space<vmem>>, vector<1x32x96xbf16>
    %20 = vector.shape_cast %19 : vector<1x32x96xbf16> to vector<32x96xbf16>
    %cst_10 = arith.constant dense<0.000000e+00> : vector<16x96xf32>
    %21 = tpu.matmul %18, %20, %cst_10 {dimension_numbers = #tpu.dot_dimension_numbers<[1], [0], [0], [1], [0, 0, 1, 1], [], []>} : vector<16x32xbf16>, vector<32x96xbf16>, vector<16x96xf32> -> vector<16x96xf32>
    %22 = vector.extract_strided_slice %21 {offsets = [0, 0], sizes = [16, 8], strides = [1, 1]} : vector<16x96xf32> to vector<16x8xf32>
    %23 = vector.shape_cast %22 : vector<16x8xf32> to vector<2x8x8xf32>
    %24 = vector.extract_strided_slice %21 {offsets = [0, 8], sizes = [16, 8], strides = [1, 1]} : vector<16x96xf32> to vector<16x8xf32>
    %25 = vector.shape_cast %24 : vector<16x8xf32> to vector<2x8x8xf32>
    %26 = vector.extract_strided_slice %21 {offsets = [0, 16], sizes = [16, 8], strides = [1, 1]} : vector<16x96xf32> to vector<16x8xf32>
    %27 = vector.shape_cast %26 : vector<16x8xf32> to vector<2x8x8xf32>
    %28 = vector.extract_strided_slice %21 {offsets = [0, 24], sizes = [16, 8], strides = [1, 1]} : vector<16x96xf32> to vector<16x8xf32>
    %29 = vector.shape_cast %28 : vector<16x8xf32> to vector<2x8x8xf32>
    %30 = tpu.concatenate %23, %25, %27, %29 in 0 : vector<2x8x8xf32>, vector<2x8x8xf32>, vector<2x8x8xf32>, vector<2x8x8xf32> -> vector<8x8x8xf32>
    %31 = vector.extract_strided_slice %21 {offsets = [0, 32], sizes = [16, 8], strides = [1, 1]} : vector<16x96xf32> to vector<16x8xf32>
    %32 = vector.shape_cast %31 : vector<16x8xf32> to vector<2x8x8xf32>
    %33 = vector.extract_strided_slice %21 {offsets = [0, 40], sizes = [16, 8], strides = [1, 1]} : vector<16x96xf32> to vector<16x8xf32>
    %34 = vector.shape_cast %33 : vector<16x8xf32> to vector<2x8x8xf32>
    %35 = vector.extract_strided_slice %21 {offsets = [0, 48], sizes = [16, 8], strides = [1, 1]} : vector<16x96xf32> to vector<16x8xf32>
    %36 = vector.shape_cast %35 : vector<16x8xf32> to vector<2x8x8xf32>
    %37 = vector.extract_strided_slice %21 {offsets = [0, 56], sizes = [16, 8], strides = [1, 1]} : vector<16x96xf32> to vector<16x8xf32>
    %38 = vector.shape_cast %37 : vector<16x8xf32> to vector<2x8x8xf32>
    %39 = tpu.concatenate %32, %34, %36, %38 in 0 : vector<2x8x8xf32>, vector<2x8x8xf32>, vector<2x8x8xf32>, vector<2x8x8xf32> -> vector<8x8x8xf32>
    %40 = vector.extract_strided_slice %21 {offsets = [0, 64], sizes = [16, 8], strides = [1, 1]} : vector<16x96xf32> to vector<16x8xf32>
    %41 = vector.shape_cast %40 : vector<16x8xf32> to vector<2x8x8xf32>
    %42 = vector.extract_strided_slice %21 {offsets = [0, 72], sizes = [16, 8], strides = [1, 1]} : vector<16x96xf32> to vector<16x8xf32>
    %43 = vector.shape_cast %42 : vector<16x8xf32> to vector<2x8x8xf32>
    %44 = vector.extract_strided_slice %21 {offsets = [0, 80], sizes = [16, 8], strides = [1, 1]} : vector<16x96xf32> to vector<16x8xf32>
    %45 = vector.shape_cast %44 : vector<16x8xf32> to vector<2x8x8xf32>
    %46 = vector.extract_strided_slice %21 {offsets = [0, 88], sizes = [16, 8], strides = [1, 1]} : vector<16x96xf32> to vector<16x8xf32>
    %47 = vector.shape_cast %46 : vector<16x8xf32> to vector<2x8x8xf32>
    %48 = tpu.concatenate %41, %43, %45, %47 in 0 : vector<2x8x8xf32>, vector<2x8x8xf32>, vector<2x8x8xf32>, vector<2x8x8xf32> -> vector<8x8x8xf32>
    %49 = arith.truncf %30 : vector<8x8x8xf32> to vector<8x8x8xbf16>
    %50 = arith.truncf %39 : vector<8x8x8xf32> to vector<8x8x8xbf16>
    "tpu.trace_start"() <{level = 10 : i32, message = "bqd,bkd->bqk"}> : () -> ()
    %cst_11 = arith.constant dense<0.000000e+00> : vector<8x8x8xf32>
    %51 = tpu.matmul %49, %50, %cst_11 {dimension_numbers = #tpu.dot_dimension_numbers<[2], [2], [1], [1], [0, 0, 0, 1, 1, 1], [0], [0]>} : vector<8x8x8xbf16>, vector<8x8x8xbf16>, vector<8x8x8xf32> -> vector<8x8x8xf32>
    "tpu.trace_stop"() : () -> ()
    %c0_12 = arith.constant 0 : index
    %c0_13 = arith.constant 0 : index
    %c0_14 = arith.constant 0 : index
    %52 = vector.load %arg2[%c0_12, %c0_13, %c0_14] : memref<8x8x8xf32, #tpu.memory_space<vmem>>, vector<8x8x8xf32>
    %53 = arith.addf %51, %52 : vector<8x8x8xf32>
    %cst_15 = arith.constant dense<0xFF800000> : vector<8x8xf32>
    %54 = vector.multi_reduction <maximumf>, %53, %cst_15 [2] : vector<8x8x8xf32> to vector<8x8xf32>
    %55 = vector.shape_cast %54 : vector<8x8xf32> to vector<8x8x1xf32>
    %56 = vector.broadcast %55 : vector<8x8x1xf32> to vector<8x8x8xf32>
    %57 = arith.subf %53, %56 : vector<8x8x8xf32>
    %58 = math.exp %57 : vector<8x8x8xf32>
    %cst_16 = arith.constant dense<0.000000e+00> : vector<8x8xf32>
    %59 = vector.multi_reduction <add>, %58, %cst_16 [2] : vector<8x8x8xf32> to vector<8x8xf32>
    %60 = vector.shape_cast %59 : vector<8x8xf32> to vector<8x8x1xf32>
    %61 = tpu.reciprocal %60 {approx = true} : vector<8x8x1xf32> -> vector<8x8x1xf32>
    %62 = vector.broadcast %61 : vector<8x8x1xf32> to vector<8x8x8xf32>
    %63 = arith.mulf %58, %62 : vector<8x8x8xf32>
    %64 = arith.truncf %63 : vector<8x8x8xf32> to vector<8x8x8xbf16>
    %65 = arith.truncf %48 : vector<8x8x8xf32> to vector<8x8x8xbf16>
    "tpu.trace_start"() <{level = 10 : i32, message = "bqk,bkd->bqd"}> : () -> ()
    %cst_17 = arith.constant dense<0.000000e+00> : vector<8x8x8xf32>
    %66 = tpu.matmul %64, %65, %cst_17 {dimension_numbers = #tpu.dot_dimension_numbers<[2], [1], [1], [2], [0, 0, 0, 1, 1, 2], [0], [0]>} : vector<8x8x8xbf16>, vector<8x8x8xbf16>, vector<8x8x8xf32> -> vector<8x8x8xf32>
    "tpu.trace_stop"() : () -> ()
    %67 = vector.extract_strided_slice %66 {offsets = [0, 0, 0], sizes = [2, 8, 8], strides = [1, 1, 1]} : vector<8x8x8xf32> to vector<2x8x8xf32>
    %68 = vector.extract_strided_slice %66 {offsets = [2, 0, 0], sizes = [2, 8, 8], strides = [1, 1, 1]} : vector<8x8x8xf32> to vector<2x8x8xf32>
    %69 = vector.extract_strided_slice %66 {offsets = [4, 0, 0], sizes = [2, 8, 8], strides = [1, 1, 1]} : vector<8x8x8xf32> to vector<2x8x8xf32>
    %70 = vector.extract_strided_slice %66 {offsets = [6, 0, 0], sizes = [2, 8, 8], strides = [1, 1, 1]} : vector<8x8x8xf32> to vector<2x8x8xf32>
    %71 = tpu.concatenate %67, %68, %69, %70 in 2 : vector<2x8x8xf32>, vector<2x8x8xf32>, vector<2x8x8xf32>, vector<2x8x8xf32> -> vector<2x8x32xf32>
    %72 = vector.shape_cast %71 : vector<2x8x32xf32> to vector<16x32xf32>
    %73 = arith.truncf %72 : vector<16x32xf32> to vector<16x32xbf16>
    %c0_18 = arith.constant 0 : index
    %c0_19 = arith.constant 0 : index
    %c0_20 = arith.constant 0 : index
    %74 = vector.load %arg5[%c0_18, %c0_19, %c0_20] : memref<1x32x32xbf16, #tpu.memory_space<vmem>>, vector<1x32x32xbf16>
    %75 = vector.shape_cast %74 : vector<1x32x32xbf16> to vector<32x32xbf16>
    %cst_21 = arith.constant dense<0.000000e+00> : vector<16x32xf32>
    %76 = tpu.matmul %73, %75, %cst_21 {dimension_numbers = #tpu.dot_dimension_numbers<[1], [0], [0], [1], [0, 0, 1, 1], [], []>} : vector<16x32xbf16>, vector<32x32xbf16>, vector<16x32xf32> -> vector<16x32xf32>
    %77 = arith.addf %3, %76 : vector<16x32xf32>
    %c0_22 = arith.constant 0 : index
    %c0_23 = arith.constant 0 : index
    %c0_24 = arith.constant 0 : index
    %78 = vector.load %arg6[%c0_22, %c0_23, %c0_24] : memref<1x1x32xf32, #tpu.memory_space<vmem>>, vector<1x1x32xf32>
    %79 = vector.shape_cast %78 : vector<1x1x32xf32> to vector<1x32xf32>
    %80 = arith.mulf %77, %77 : vector<16x32xf32>
    %cst_25 = arith.constant dense<0.000000e+00> : vector<16xf32>
    %81 = vector.multi_reduction <add>, %80, %cst_25 [1] : vector<16x32xf32> to vector<16xf32>
    %82 = vector.shape_cast %81 : vector<16xf32> to vector<16x1xf32>
    %cst_26 = arith.constant 3.200000e+01 : f32
    %83 = vector.broadcast %cst_26 : f32 to vector<16x1xf32>
    %84 = arith.divf %82, %83 : vector<16x1xf32>
    %cst_27 = arith.constant 9.99999997E-7 : f32
    %85 = vector.broadcast %cst_27 : f32 to vector<16x1xf32>
    %86 = arith.addf %84, %85 : vector<16x1xf32>
    %87 = math.rsqrt %86 : vector<16x1xf32>
    %88 = vector.broadcast %87 : vector<16x1xf32> to vector<16x32xf32>
    %89 = arith.mulf %77, %88 : vector<16x32xf32>
    %90 = vector.broadcast %79 : vector<1x32xf32> to vector<16x32xf32>
    %91 = arith.mulf %89, %90 : vector<16x32xf32>
    %92 = arith.truncf %91 : vector<16x32xf32> to vector<16x32xbf16>
    %c0_28 = arith.constant 0 : index
    %c0_29 = arith.constant 0 : index
    %c0_30 = arith.constant 0 : index
    %93 = vector.load %arg7[%c0_28, %c0_29, %c0_30] : memref<1x32x128xbf16, #tpu.memory_space<vmem>>, vector<1x32x128xbf16>
    %94 = vector.shape_cast %93 : vector<1x32x128xbf16> to vector<32x128xbf16>
    %cst_31 = arith.constant dense<0.000000e+00> : vector<16x128xf32>
    %95 = tpu.matmul %92, %94, %cst_31 {dimension_numbers = #tpu.dot_dimension_numbers<[1], [0], [0], [1], [0, 0, 1, 1], [], []>} : vector<16x32xbf16>, vector<32x128xbf16>, vector<16x128xf32> -> vector<16x128xf32>
    %96 = vector.extract_strided_slice %95 {offsets = [0, 0], sizes = [16, 64], strides = [1, 1]} : vector<16x128xf32> to vector<16x64xf32>
    %97 = vector.extract_strided_slice %95 {offsets = [0, 64], sizes = [16, 64], strides = [1, 1]} : vector<16x128xf32> to vector<16x64xf32>
    %cst_32 = arith.constant 5.000000e-01 : f32
    %98 = vector.broadcast %cst_32 : f32 to vector<16x64xf32>
    %99 = arith.mulf %98, %96 : vector<16x64xf32>
    %cst_33 = arith.constant 4.471500e-02 : f32
    %100 = vector.broadcast %cst_33 : f32 to vector<16x64xf32>
    %101 = arith.mulf %100, %96 : vector<16x64xf32>
    %102 = arith.mulf %101, %96 : vector<16x64xf32>
    %103 = arith.mulf %102, %96 : vector<16x64xf32>
    %104 = arith.addf %96, %103 : vector<16x64xf32>
    %cst_34 = arith.constant 0.797884583 : f32
    %105 = vector.broadcast %cst_34 : f32 to vector<16x64xf32>
    %106 = arith.mulf %105, %104 : vector<16x64xf32>
    %107 = math.tanh %106 : vector<16x64xf32>
    %cst_35 = arith.constant 1.000000e+00 : f32
    %108 = vector.broadcast %cst_35 : f32 to vector<16x64xf32>
    %109 = arith.addf %108, %107 : vector<16x64xf32>
    %110 = arith.mulf %99, %109 : vector<16x64xf32>
    %111 = arith.mulf %110, %97 : vector<16x64xf32>
    %112 = arith.truncf %111 : vector<16x64xf32> to vector<16x64xbf16>
    %c0_36 = arith.constant 0 : index
    %c0_37 = arith.constant 0 : index
    %c0_38 = arith.constant 0 : index
    %113 = vector.load %arg8[%c0_36, %c0_37, %c0_38] : memref<1x64x32xbf16, #tpu.memory_space<vmem>>, vector<1x64x32xbf16>
    %114 = vector.shape_cast %113 : vector<1x64x32xbf16> to vector<64x32xbf16>
    %cst_39 = arith.constant dense<0.000000e+00> : vector<16x32xf32>
    %115 = tpu.matmul %112, %114, %cst_39 {dimension_numbers = #tpu.dot_dimension_numbers<[1], [0], [0], [1], [0, 0, 1, 1], [], []>} : vector<16x64xbf16>, vector<64x32xbf16>, vector<16x32xf32> -> vector<16x32xf32>
    %116 = arith.addf %77, %115 : vector<16x32xf32>
    %c0_40 = arith.constant 0 : index
    %c0_41 = arith.constant 0 : index
    %117 = vector.load %arg11[%c0_40, %c0_41] : memref<16x32xf32, #tpu.memory_space<vmem>>, vector<16x32xf32>
    tpu.vector_store %arg11[%c0_40, %c0_41], %116 {strides = array<i32>} : memref<16x32xf32, #tpu.memory_space<vmem>>, vector<16x32xf32>,
    %c1_i32 = arith.constant 1 : i32
    %118 = arith.cmpi eq, %arg0, %c1_i32 : i32
    %119 = arith.extui %118 : i1 to i32
    %c0_i32_42 = arith.constant 0 : i32
    %120 = arith.cmpi ne, %119, %c0_i32_42 : i32
    scf.if %120 {
      %c0_43 = arith.constant 0 : index
      %c0_44 = arith.constant 0 : index
      %121 = vector.load %arg9[%c0_43, %c0_44] : memref<1x32xf32, #tpu.memory_space<vmem>>, vector<1x32xf32>
      %122 = arith.mulf %116, %116 : vector<16x32xf32>
      %cst_45 = arith.constant dense<0.000000e+00> : vector<16xf32>
      %123 = vector.multi_reduction <add>, %122, %cst_45 [1] : vector<16x32xf32> to vector<16xf32>
      %124 = vector.shape_cast %123 : vector<16xf32> to vector<16x1xf32>
      %cst_46 = arith.constant 3.200000e+01 : f32
      %125 = vector.broadcast %cst_46 : f32 to vector<16x1xf32>
      %126 = arith.divf %124, %125 : vector<16x1xf32>
      %cst_47 = arith.constant 9.99999997E-7 : f32
      %127 = vector.broadcast %cst_47 : f32 to vector<16x1xf32>
      %128 = arith.addf %126, %127 : vector<16x1xf32>
      %129 = math.rsqrt %128 : vector<16x1xf32>
      %130 = vector.broadcast %129 : vector<16x1xf32> to vector<16x32xf32>
      %131 = arith.mulf %116, %130 : vector<16x32xf32>
      %132 = vector.broadcast %121 : vector<1x32xf32> to vector<16x32xf32>
      %133 = arith.mulf %131, %132 : vector<16x32xf32>
      %c0_48 = arith.constant 0 : index
      %c0_49 = arith.constant 0 : index
      %134 = vector.load %arg10[%c0_48, %c0_49] : memref<16x32xf32, #tpu.memory_space<vmem>>, vector<16x32xf32>
      tpu.vector_store %arg10[%c0_48, %c0_49], %133 {strides = array<i32>} : memref<16x32xf32, #tpu.memory_space<vmem>>, vector<16x32xf32>,
    } else {
    }
    return
  }
  func.func @transform_0(%arg0: i32) -> (i32, i32) {
    %c0_i32 = arith.constant 0 : i32
    %c0_i32_0 = arith.constant 0 : i32
    %c0_i32_1 = arith.constant 0 : i32
    return %c0_i32, %c0_i32_0 : i32, i32
  }
  func.func @transform_1(%arg0: i32) -> (i32, i32, i32) {
    %c0_i32 = arith.constant 0 : i32
    %c0_i32_0 = arith.constant 0 : i32
    %c0_i32_1 = arith.constant 0 : i32
    %c0_i32_2 = arith.constant 0 : i32
    return %c0_i32, %c0_i32_0, %c0_i32_1 : i32, i32, i32
  }
  func.func @transform_2(%arg0: i32) -> (i32, i32, i32) {
    %c0_i32 = arith.constant 0 : i32
    %c0_i32_0 = arith.constant 0 : i32
    %c0_i32_1 = arith.constant 0 : i32
    return %arg0, %c0_i32, %c0_i32_0 : i32, i32, i32
  }
  func.func @transform_3(%arg0: i32) -> (i32, i32, i32) {
    %c0_i32 = arith.constant 0 : i32
    %c0_i32_0 = arith.constant 0 : i32
    %c0_i32_1 = arith.constant 0 : i32
    return %arg0, %c0_i32, %c0_i32_0 : i32, i32, i32
  }
  func.func @transform_4(%arg0: i32) -> (i32, i32, i32) {
    %c0_i32 = arith.constant 0 : i32
    %c0_i32_0 = arith.constant 0 : i32
    %c0_i32_1 = arith.constant 0 : i32
    return %arg0, %c0_i32, %c0_i32_0 : i32, i32, i32
  }
  func.func @transform_5(%arg0: i32) -> (i32, i32, i32) {
    %c0_i32 = arith.constant 0 : i32
    %c0_i32_0 = arith.constant 0 : i32
    %c0_i32_1 = arith.constant 0 : i32
    return %arg0, %c0_i32, %c0_i32_0 : i32, i32, i32
  }
  func.func @transform_6(%arg0: i32) -> (i32, i32, i32) {
    %c0_i32 = arith.constant 0 : i32
    %c0_i32_0 = arith.constant 0 : i32
    %c0_i32_1 = arith.constant 0 : i32
    return %arg0, %c0_i32, %c0_i32_0 : i32, i32, i32
  }
  func.func @transform_7(%arg0: i32) -> (i32, i32, i32) {
    %c0_i32 = arith.constant 0 : i32
    %c0_i32_0 = arith.constant 0 : i32
    %c0_i32_1 = arith.constant 0 : i32
    return %arg0, %c0_i32, %c0_i32_0 : i32, i32, i32
  }
  func.func @transform_8(%arg0: i32) -> (i32, i32) {
    %c0_i32 = arith.constant 0 : i32
    %c0_i32_0 = arith.constant 0 : i32
    %c0_i32_1 = arith.constant 0 : i32
    return %c0_i32, %c0_i32_0 : i32, i32
  }
  func.func @transform_9(%arg0: i32) -> (i32, i32) {
    %c0_i32 = arith.constant 0 : i32
    %c0_i32_0 = arith.constant 0 : i32
    %c0_i32_1 = arith.constant 0 : i32
    return %c0_i32, %c0_i32_0 : i32, i32
  }
}

</mosaic_0001>

<bundles_post_ra>
// kernel: frozen_clip_t5_encode.3
= control target key start
LH: loop header
LB: loop body
LE: loop exit
PB: predicated region body
PF: predicated region fallthrough
CT: control target
= control target key end

     0   :  { %14 = vsyncpa [#allocation4], 0  ;;  %s2288_s30 = smov 0   ;;  %s2657_s0 = inlined_call_operand.vmem [shape: f32[16,32], index: 0, kind: input, shape index: {}]   ;;  %s2658_s1 = inlined_call_operand.vmem [shape: f32[8,8,8], index: 1, kind: input, shape index: {}]   ;;  %s2659_s2 = inlined_call_operand.vmem [shape: f32[2,1,32], index: 2, kind: input, shape index: {}]   ;;  %s2660_s3 = inlined_call_operand.vmem [shape: bf16[2,32,96], index: 3, kind: input, shape index: {}]   ;;  %s2661_s4 = inlined_call_operand.vmem [shape: bf16[2,32,32], index: 4, kind: input, shape index: {}]   ;;  %s2662_s5 = inlined_call_operand.vmem [shape: f32[2,1,32], index: 5, kind: input, shape index: {}]   ;;  %s2663_s6 = inlined_call_operand.vmem [shape: bf16[2,32,128], index: 6, kind: input, shape index: {}]   ;;  %s2664_s7 = inlined_call_operand.vmem [shape: bf16[2,64,32], index: 7, kind: input, shape index: {}]   ;;  %s2665_s8 = inlined_call_operand.vmem [shape: f32[1,32], index: 8, kind: input, shape index: {}]   ;;  %s2666_s9 = inlined_call_operand.hbm [shape: f32[16,32], index: 9, kind: output, shape index: {}]  }
   0x1 LB: > { %s2294_s10 = sadd.s32 4294967295, %s2224_s30   ;;  %p1844_p0 = scmp.ge.s32.totalorder %s2224_s30, 1  ;;  %s2224_s30 = sphi %s2288_s30, %s20_s30  }
   0x2   : > { %p329_p1 = scmp.lt.s32.totalorder %s2224_s30, 3 }
   0x4   : > { %p330_p2 = pnand %p1844_p0, %p329_p1 }
   0x5   : > { %p381_p3 = scmp.lt.s32.totalorder (!%p330_p2), %s2294_s10, 1  ;;  %p1853_p4 = scmp.ne.s32.totalorder (!%p330_p2), %s2294_s10, 0 }
   0x6   : > { %333 = sbr.rel (%p330_p2) target bundleno = 2705 (0xa91), region = 56 }
   0xd   : > { %s2300_s11 = scalar_select %p381_p3, %s2294_s10, 1 }
   0xe   : > { %411 = sbr.rel (%p1853_p4) target bundleno = 21 (0x15), region = 60  ;;  %v412_v0 = vld [vmem:[%s2657_s0] sm:$0xff] (!%p1853_p4)  ;;  %vm414_vm0 = vcmask (!%p1853_p4), 261120   ;;  %v413_v1 = vld [vmem:[%s2657_s0 + $0x8] sm:$0xff] (!%p1853_p4) }
   0xf   : > { %s383_s14 = scalar_lea.vmem %s2659_s2, %s2300_s11  ;;  %s1892_s15 = sshll.u32 %s2300_s11, 4  ;;  %415 = vst.msk [vmem:[#allocation2] sm:$0xff] (!%p1853_p4), %vm414_vm0, %v412_v0  ;;  %416 = vst.msk [vmem:[#allocation2 + $0x8] sm:$0xff] (!%p1853_p4), %vm414_vm0, %v413_v1 }
  0x10   : > { %s388_s18 = scalar_lea.vmem %s2660_s3, %s1892_s15  ;;  %s2313_s21 = scalar_lea.vmem %s2661_s4, %s1892_s15 }
  0x11   : > { %s396_s24 = scalar_lea.vmem %s2662_s5, %s2300_s11  ;;  %s2322_s27 = scalar_lea.vmem %s2663_s6, %s1892_s15 }
  0x12   : > { %s1895_s28 = sshll.u32 %s2300_s11, 5 }
  0x13   : > { %s2328_s13 = scalar_lea.vmem %s2664_s7, %s1895_s28 }
  0x15 PF: > { %vm422_vm1 = vcmask 261120   ;;  %v2130_v8 = vld [vmem:[%s388_s18] sm:$0xff]   ;;  %v2226_v9 = vmov 0.0   ;;  %vm2227_vm2 = vmmov 0   ;;  %v2131_v10 = vld [vmem:[%s388_s18 + $0x8] sm:$0xff]   ;;  %s2228_s22 = smov 104  }
  0x16   : > { %v2337_v2 = vld [vmem:[#allocation2] sm:$0xff]  ;;  %v2339_v3 = vld [vmem:[#allocation2 + $0x8] sm:$0xff]  ;;  %1942 = vmatprep.subr.bf16.mxu0 %v2226_v9  ;;  %1946 = vmatprep.mubr.msk.bf16.mxu0 %vm2227_vm2, %v2226_v9  ;;  %s2229_s23 = smov 120   ;;  %s2231_s25 = smov 96   ;;  %vm546_vm3 = vcmask 64512   ;;  %vm1037_vm4 = vcmask 1043456  }
  0x17   : > { %v420_v4 = vmul.f32 %v2337_v2, %v2337_v2  ;;  %v421_v5 = vmul.f32 %v2339_v3, %v2339_v3  ;;  %1943 = vmatpush3.bf16.msra.mxu0 %v2130_v8  ;;  %1950 = vmatprep.subr.bf16.mxu1 %v2226_v9  ;;  %v1854_v20 = vld [vmem:[%s383_s14] ss:$0 sm:$0xff]  ;;  %s2230_s14 = smov 112   ;;  %s2232_s26 = smov 64   ;;  %v536_v8 = vld [vmem:[%s2658_s1 + $0x8] sm:$0xff]  ;;  %vm1443_vm5 = vcmask 130048  }
  0x18   : > { %1944 = vmatprep.subr.bf16.mxu0 %v2226_v9  ;;  %1952 = vmatprep.mubr.msk.bf16.mxu1 %vm2227_vm2, %v2226_v9  ;;  %v535_v1 = vld [vmem:[%s2658_s1] sm:$0xff]  ;;  %s2233_s16 = smov 8   ;;  %s2234_s17 = smov 16   ;;  %vm1446_vm6 = vcmask 195584   ;;  %vm1659_vm7 = vcmask 523264  }
  0x19   : > { %v423_v6 = vsel %vm422_vm1, %v420_v4, 0.0  ;;  %v426_v7 = vsel %vm422_vm1, %v421_v5, 0.0  ;;  %s2235_s19 = smov 24   ;;  %p1886_p5 = scmp.ne.s32.totalorder %s2294_s10, 1 }
  0x1a   : > { %424 = vadd.xlane.f32.xlu0 %v423_v6 }
  0x1b   : > { %1945 = vmatpush3.bf16.msra.mxu0 %v2131_v10 }
  0x1c   : > { %1956 = vmatprep.subr.bf16.mxu0 %v2226_v9 }
  0x1e   : > { %427 = vadd.xlane.f32.xlu0 %v426_v7 }
  0xa7   : > { %v425_v11 = vpop.xlane.xlu0 %424 }
  0xa8   : > { %v430_v12 = vmul.f32 0.03125, %v425_v11 }
  0xaa   : > { %v432_v13 = vadd.f32 1e-06, %v430_v12 }
  0xab   : > { %v428_v14 = vpop.xlane.xlu0 %427 }
  0xac   : > { %2140 = vrsqrt.f32 %v432_v13  ;;  %v431_v15 = vmul.f32 0.03125, %v428_v14 }
  0xae   : > { %v433_v16 = vadd.f32 1e-06, %v431_v15 }
  0xb0   : > { %2142 = vrsqrt.f32 %v433_v16 }
  0xb6   : > { %v2141_v17 = vpop.eup %2140 }
  0xb7   : > { %v436_v18 = vmul.f32 %v2141_v17, %v2337_v2 }
  0xb9   : > { %v444_v22 = vmul.f32 %v1854_v20, %v436_v18  ;;  %v537_v18 = vld [vmem:[%s2658_s1 + $0x10] sm:$0xff] }
  0xba   : > { %v2143_v19 = vpop.eup %2142 }
  0xbb   : > { %v437_v21 = vmul.f32 %v2143_v19, %v2339_v3 }
  0xbd   : > { %v445_v23 = vmul.f32 %v1854_v20, %v437_v21 }
  0xbf   : > { %v446_v24 = vpack.c.bf16 %v445_v23, %v444_v22  ;;  %v538_v23 = vld [vmem:[%s2658_s1 + $0x18] sm:$0xff] }
  0xc1   : > { %1947 = vmatmul.mubr.msk.bf16.vlgmr.msra.gmra.mrb[0].mxu0 %vm422_vm1, %v446_v24 }
  0xc2   : > { %1958 = vmatprep.mubr.msk.bf16.mxu0 %vm2227_vm2, %v2226_v9 }
 0x194   : > { %v500_v25 = vpop.f32.mrb[0].mxu0 }
 0x195   : > { %v1948_v26 = vpop.f32.mrb[1].mxu0  ;;  %v527_v30 = vpack.c.bf16 %v500_v25, %v500_v25 }
 0x196   : > { %v503_v27 = vpop.f32.mrb[2].mxu0 }
 0x197   : > { %v1949_v28 = vpop.f32.mrb[3].mxu0  ;;  %v2110_v29 = vpack.i.bf16 %v503_v27, %v500_v25  ;;  %v2366_v31 = vpack.c.bf16 %v503_v27, %v503_v27 }
 0x199   : > { %2111 = vrot.lane.b32.xlu0 %v2110_v29, %s2228_s22  ;;  %2101 = vrot.lane.b32.xlu1 %v2110_v29, %s2229_s23 }
 0x19d   : > { %2106 = vrot.lane.b32.xlu1 %v2110_v29, %s2230_s14 }
 0x1a1   : > { %544 = vrot.lane.b32.xlu1 %v527_v30, %s2231_s25 }
 0x1a5   : > { %594 = vrot.lane.b32.xlu1 %v2366_v31, %s2231_s25 }
 0x20b   : > { %v2112_v32 = vpop.permute.xlu0 %2111  ;;  %v2102_v33 = vpop.permute.xlu1 %2101 }
 0x20c   : > { %v2113_v34 = vunpack.i.l.bf16 %v2112_v32  ;;  %v2103_v35 = vunpack.i.l.bf16 %v2102_v33  ;;  %v2104_v37 = vunpack.i.h.bf16 %v2102_v33  ;;  %v2114_v48 = vunpack.i.h.bf16 %v2112_v32 }
 0x20e   : > { %v2370_v36 = vpack.c.bf16 %v2113_v34, %v2113_v34  ;;  %v2372_v38 = vpack.c.bf16 %v2103_v35, %v2103_v35  ;;  %v2378_v40 = vpack.c.bf16 %v2104_v37, %v2104_v37  ;;  %v2397_v50 = vpack.c.bf16 %v2114_v48, %v2114_v48 }
 0x20f   : > { %v2107_v39 = vpop.permute.xlu1 %2106 }
 0x210   : > { %839 = vrot.lane.b32.xlu0 %v2370_v36, %s2231_s25  ;;  %643 = vrot.lane.b32.xlu1 %v2372_v38, %s2231_s25  ;;  %v2108_v41 = vunpack.i.l.bf16 %v2107_v39  ;;  %v2109_v44 = vunpack.i.h.bf16 %v2107_v39 }
 0x212   : > { %v2383_v45 = vpack.c.bf16 %v2108_v41, %v2108_v41  ;;  %v2389_v49 = vpack.c.bf16 %v2109_v44, %v2109_v44  ;;  %v540_v41 = vld [vmem:[%s2658_s1 + $0x28] sm:$0xff] }
 0x213   : > { %v545_v42 = vpop.permute.xlu1 %544 }
 0x214   : > { %692 = vrot.lane.b32.xlu1 %v2378_v40, %s2231_s25  ;;  %v551_v43 = vsel %vm546_vm3, %v545_v42, 0 }
 0x215   : > { %1951 = vmatpush3.bf16.xpose.msra.mxu1 %v551_v43 }
 0x216   : > { %1962 = vmatprep.subr.bf16.mxu1 %v2226_v9 }
 0x217   : > { %v595_v46 = vpop.permute.xlu1 %594 }
 0x218   : > { %v600_v47 = vsel %vm546_vm3, %v595_v46, 0  ;;  %741 = vrot.lane.b32.xlu1 %v2383_v45, %s2231_s25 }
 0x219   : > { %1957 = vmatpush3.bf16.xpose.msra.mxu0 %v600_v47 }
 0x21a   : > { %1968 = vmatprep.subr.bf16.mxu0 %v2226_v9 }
 0x21c   : > { %1953 = vmatmul.mubr.msk.bf16.vlgmr.msra.gmra.mrb[0].mxu1 %vm546_vm3, %v527_v30  ;;  %790 = vrot.lane.b32.xlu1 %v2389_v49, %s2231_s25 }
 0x21d   : > { %1964 = vmatprep.mubr.msk.bf16.mxu1 %vm2227_vm2, %v2226_v9 }
 0x220   : > { %888 = vrot.lane.b32.xlu1 %v2397_v50, %s2231_s25  ;;  %1959 = vmatmul.mubr.msk.bf16.vlgmr.msra.gmra.mrb[4].mxu0 %vm546_vm3, %v2366_v31 }
 0x221   : > { %1970 = vmatprep.mubr.msk.bf16.mxu0 %vm2227_vm2, %v2226_v9 }
 0x224   : > { %1032 = vrot.lane.b32.xlu1 %v527_v30, %s2232_s26  ;;  %v539_v30 = vld [vmem:[%s2658_s1 + $0x20] sm:$0xff] }
 0x282   : > { %v644_v51 = vpop.permute.xlu1 %643  ;;  %v840_v59 = vpop.permute.xlu0 %839 }
 0x283   : > { %v649_v52 = vsel %vm546_vm3, %v644_v51, 0  ;;  %v845_v61 = vsel %vm546_vm3, %v840_v59, 0  ;;  %v541_v51 = vld [vmem:[%s2658_s1 + $0x30] sm:$0xff] }
 0x284   : > { %1963 = vmatpush3.bf16.xpose.msra.mxu1 %v649_v52 }
 0x285   : > { %1974 = vmatprep.subr.bf16.mxu1 %v2226_v9 }
 0x286   : > { %v693_v53 = vpop.permute.xlu1 %692 }
 0x287   : > { %v698_v54 = vsel %vm546_vm3, %v693_v53, 0 }
 0x288   : > { %1969 = vmatpush3.bf16.xpose.msra.mxu0 %v698_v54 }
 0x289   : > { %1980 = vmatprep.subr.bf16.mxu0 %v2226_v9 }
 0x28a   : > { %v742_v55 = vpop.permute.xlu1 %741 }
 0x28b   : > { %v747_v56 = vsel %vm546_vm3, %v742_v55, 0  ;;  %1965 = vmatmul.mubr.msk.bf16.vlgmr.msra.gmra.mrb[4].mxu1 %vm546_vm3, %v2372_v38 }
 0x28c   : > { %1975 = vmatpush3.bf16.xpose.msra.mxu1 %v747_v56  ;;  %1976 = vmatprep.mubr.msk.bf16.mxu1 %vm2227_vm2, %v2226_v9 }
 0x28d   : > { %1986 = vmatprep.subr.bf16.mxu1 %v2226_v9 }
 0x28e   : > { %v791_v57 = vpop.permute.xlu1 %790 }
 0x28f   : > { %v796_v58 = vsel %vm546_vm3, %v791_v57, 0  ;;  %1971 = vmatmul.mubr.msk.bf16.vlgmr.msra.gmra.mrb[8].mxu0 %vm546_vm3, %v2378_v40 }
 0x290   : > { %1981 = vmatpush3.bf16.xpose.msra.mxu0 %v796_v58  ;;  %1982 = vmatprep.mubr.msk.bf16.mxu0 %vm2227_vm2, %v2226_v9  ;;  %v542_v58 = vld [vmem:[%s2658_s1 + $0x38] sm:$0xff] }
 0x291   : > { %1992 = vmatprep.subr.bf16.mxu0 %v2226_v9 }
 0x292   : > { %v889_v60 = vpop.permute.xlu1 %888 }
 0x293   : > { %1977 = vmatmul.mubr.msk.bf16.vlgmr.msra.gmra.mrb[8].mxu1 %vm546_vm3, %v2383_v45  ;;  %v894_v62 = vsel %vm546_vm3, %v889_v60, 0 }
 0x294   : > { %1987 = vmatpush3.bf16.xpose.msra.mxu1 %v845_v61  ;;  %1988 = vmatprep.mubr.msk.bf16.mxu1 %vm2227_vm2, %v2226_v9 }
 0x295   : > { %1998 = vmatprep.subr.bf16.mxu1 %v2226_v9 }
 0x296   : > { %v1033_v63 = vpop.permute.xlu1 %1032 }
 0x297   : > { %1983 = vmatmul.mubr.msk.bf16.vlgmr.msra.gmra.mrb[12].mxu0 %vm546_vm3, %v2389_v49  ;;  %v1039_v0 = vsel %vm1037_vm4, %v1033_v63, 0 }
 0x298   : > { %1993 = vmatpush3.bf16.xpose.msra.mxu0 %v894_v62  ;;  %1994 = vmatprep.mubr.msk.bf16.mxu0 %vm2227_vm2, %v2226_v9 }
 0x299   : > { %2004 = vmatprep.subr.bf16.mxu0 %v2226_v9 }
 0x29b   : > { %1989 = vmatmul.mubr.msk.bf16.vlgmr.msra.gmra.mrb[12].mxu1 %vm546_vm3, %v2370_v36 }
 0x29c   : > { %1999 = vmatpush3.bf16.msra.mxu1 %v1039_v0  ;;  %2000 = vmatprep.mubr.msk.bf16.mxu1 %vm2227_vm2, %v2226_v9 }
 0x29d   : > { %2010 = vmatprep.subr.bf16.mxu1 %v2226_v9 }
 0x29f   : > { %1995 = vmatmul.mubr.msk.bf16.vlgmr.msra.gmra.mrb[16].mxu0 %vm546_vm3, %v2397_v50 }
 0x2a0   : > { %2006 = vmatprep.mubr.msk.bf16.mxu0 %vm2227_vm2, %v2226_v9 }
 0x2ef   : > { %v587_v4 = vpop.f32.mrb[0].mxu1 }
 0x2f0   : > { %v2447_v5 = vadd.f32 %v587_v4, %v535_v1  ;;  %v1954_v6 = vpop.f32.mrb[1].mxu1 }
 0x2f1   : > { %v590_v7 = vpop.f32.mrb[2].mxu1 }
 0x2f2   : > { %v1955_v10 = vpop.f32.mrb[3].mxu1  ;;  %v936_v11 = vsel %vm546_vm3, %v2447_v5, -inf }
 0x2f3   : > { %937 = vmax.xlane.f32.xlu0 %v936_v11  ;;  %v636_v12 = vpop.f32.mrb[4].mxu0 }
 0x2f4   : > { %v637_v13 = vadd.f32 %v636_v12, %v536_v8  ;;  %v1960_v14 = vpop.f32.mrb[5].mxu0 }
 0x2f5   : > { %v639_v15 = vpop.f32.mrb[6].mxu0 }
 0x2f6   : > { %v1961_v16 = vpop.f32.mrb[7].mxu0  ;;  %v939_v17 = vsel %vm546_vm3, %v637_v13, -inf }
 0x2f7   : > { %940 = vmax.xlane.f32.xlu1 %v939_v17 }
 0x35e   : > { %v685_v19 = vpop.f32.mrb[4].mxu1 }
 0x35f   : > { %v2458_v20 = vadd.f32 %v685_v19, %v537_v18  ;;  %v1966_v21 = vpop.f32.mrb[5].mxu1 }
 0x360   : > { %v688_v22 = vpop.f32.mrb[6].mxu1 }
 0x361   : > { %v1967_v24 = vpop.f32.mrb[7].mxu1  ;;  %v942_v25 = vsel %vm546_vm3, %v2458_v20, -inf }
 0x362   : > { %943 = vmax.xlane.f32.xlu0 %v942_v25  ;;  %v734_v26 = vpop.f32.mrb[8].mxu0 }
 0x363   : > { %v735_v27 = vadd.f32 %v734_v26, %v538_v23  ;;  %v1972_v28 = vpop.f32.mrb[9].mxu0 }
 0x364   : > { %v737_v29 = vpop.f32.mrb[10].mxu0 }
 0x365   : > { %v1973_v32 = vpop.f32.mrb[11].mxu0  ;;  %v945_v33 = vsel %vm546_vm3, %v735_v27, -inf }
 0x366   : > { %v783_v34 = vpop.f32.mrb[8].mxu1  ;;  %946 = vmax.xlane.f32.xlu0 %v945_v33 }
 0x367   : > { %v2469_v35 = vadd.f32 %v783_v34, %v539_v30  ;;  %v1978_v37 = vpop.f32.mrb[9].mxu1 }
 0x368   : > { %v786_v39 = vpop.f32.mrb[10].mxu1 }
 0x369   : > { %v1979_v42 = vpop.f32.mrb[11].mxu1  ;;  %v948_v43 = vsel %vm546_vm3, %v2469_v35, -inf }
 0x36a   : > { %949 = vmax.xlane.f32.xlu1 %v948_v43  ;;  %v832_v44 = vpop.f32.mrb[12].mxu0 }
 0x36b   : > { %v2476_v46 = vadd.f32 %v832_v44, %v540_v41  ;;  %v1984_v47 = vpop.f32.mrb[13].mxu0 }
 0x36c   : > { %v835_v48 = vpop.f32.mrb[14].mxu0 }
 0x36d   : > { %v1985_v52 = vpop.f32.mrb[15].mxu0  ;;  %v951_v53 = vsel %vm546_vm3, %v2476_v46, -inf }
 0x36e   : > { %v881_v54 = vpop.f32.mrb[12].mxu1  ;;  %952 = vmax.xlane.f32.xlu0 %v951_v53 }
 0x36f   : > { %v882_v55 = vadd.f32 %v881_v54, %v541_v51  ;;  %v1990_v56 = vpop.f32.mrb[13].mxu1 }
 0x370   : > { %v884_v57 = vpop.f32.mrb[14].mxu1 }
 0x371   : > { %v1991_v59 = vpop.f32.mrb[15].mxu1  ;;  %v954_v60 = vsel %vm546_vm3, %v882_v55, -inf }
 0x372   : > { %955 = vmax.xlane.f32.xlu1 %v954_v60  ;;  %v930_v61 = vpop.f32.mrb[16].mxu0 }
 0x373   : > { %v931_v62 = vadd.f32 %v930_v61, %v542_v58  ;;  %v1996_v63 = vpop.f32.mrb[17].mxu0 }
 0x374   : > { %v933_v0 = vpop.f32.mrb[18].mxu0 }
 0x375   : > { %v1997_v1 = vpop.f32.mrb[19].mxu0  ;;  %v957_v4 = vsel %vm546_vm3, %v931_v62, -inf }
 0x376   : > { %958 = vmax.xlane.f32.xlu0 %v957_v4 }
 0x380   : > { %v938_v6 = vpop.xlane.xlu0 %937 }
 0x381   : > { %v960_v8 = vsub.f32 %v2447_v5, %v938_v6 }
 0x383   : > { %1129 = vrot.lane.b32.xlu1 %v2372_v38, %s2232_s26  ;;  %v968_v11 = vmul.f32 1.442695, %v960_v8 }
 0x384   : > { %v941_v7 = vpop.xlane.xlu1 %940 }
 0x385   : > { %v961_v10 = vsub.f32 %v637_v13, %v941_v7  ;;  %2144 = vpow2.f32 %v968_v11 }
 0x387   : > { %1177 = vrot.lane.b32.xlu1 %v2378_v40, %s2232_s26  ;;  %v970_v12 = vmul.f32 1.442695, %v961_v10 }
 0x389   : > { %2146 = vpow2.f32 %v970_v12 }
 0x38c   : > { %1081 = vrot.lane.b32.xlu0 %v2366_v31, %s2232_s26 }
 0x38f   : > { %v2145_v14 = vpop.eup %2144 }
 0x390   : > { %v984_v16 = vsel %vm546_vm3, %v2145_v14, 0.0 }
 0x393   : > { %v2147_v15 = vpop.eup %2146 }
 0x394   : > { %v987_v38 = vsel %vm546_vm3, %v2147_v15, 0.0 }
 0x3ab   : > { %985 = vadd.xlane.f32.xlu1 %v984_v16  ;;  %988 = vadd.xlane.f32.xlu0 %v987_v38 }
 0x3ef   : > { %v944_v40 = vpop.xlane.xlu0 %943 }
 0x3f0   : > { %v962_v31 = vsub.f32 %v2458_v20, %v944_v40 }
 0x3f2   : > { %v972_v17 = vmul.f32 1.442695, %v962_v31 }
 0x3f3   : > { %v947_v18 = vpop.xlane.xlu0 %946 }
 0x3f4   : > { %2148 = vpow2.f32 %v972_v17  ;;  %v963_v5 = vsub.f32 %v735_v27, %v947_v18 }
 0x3f6   : > { %v974_v13 = vmul.f32 1.442695, %v963_v5 }
 0x3f7   : > { %v950_v27 = vpop.xlane.xlu1 %949 }
 0x3f8   : > { %2150 = vpow2.f32 %v974_v13  ;;  %v964_v28 = vsub.f32 %v2469_v35, %v950_v27 }
 0x3fa   : > { %v976_v32 = vmul.f32 1.442695, %v964_v28 }
 0x3fb   : > { %v953_v21 = vpop.xlane.xlu0 %952 }
 0x3fc   : > { %v965_v30 = vsub.f32 %v2476_v46, %v953_v21  ;;  %2152 = vpow2.f32 %v976_v32 }
 0x3fe   : > { %v2498_v19 = vpop.eup %2148  ;;  %v978_v34 = vmul.f32 1.442695, %v965_v30 }
 0x3ff   : > { %v990_v22 = vsel %vm546_vm3, %v2498_v19, 0.0  ;;  %v956_v29 = vpop.xlane.xlu1 %955 }
 0x400   : > { %991 = vadd.xlane.f32.xlu1 %v990_v22  ;;  %v966_v33 = vsub.f32 %v882_v55, %v956_v29  ;;  %2154 = vpow2.f32 %v978_v34 }
 0x402   : > { %v2502_v23 = vpop.eup %2150  ;;  %v980_v37 = vmul.f32 1.442695, %v966_v33 }
 0x403   : > { %v959_v24 = vpop.xlane.xlu0 %958  ;;  %v993_v25 = vsel %vm546_vm3, %v2502_v23, 0.0  ;;  %v1130_v42 = vpop.permute.xlu1 %1129 }
 0x404   : > { %994 = vadd.xlane.f32.xlu0 %v993_v25  ;;  %v967_v39 = vsub.f32 %v931_v62, %v959_v24  ;;  %2156 = vpow2.f32 %v980_v37  ;;  %v1135_v60 = vsel %vm1037_vm4, %v1130_v42, 0 }
 0x406   : > { %v982_v41 = vmul.f32 1.442695, %v967_v39 }
 0x407   : > { %v1082_v20 = vpop.permute.xlu0 %1081  ;;  %v1178_v43 = vpop.permute.xlu1 %1177 }
 0x408   : > { %v1087_v26 = vsel %vm1037_vm4, %v1082_v20, 0  ;;  %2158 = vpow2.f32 %v982_v41  ;;  %v1183_v61 = vsel %vm1037_vm4, %v1178_v43, 0 }
 0x409   : > { %2005 = vmatpush3.bf16.msra.mxu0 %v1087_v26 }
 0x40a   : > { %2016 = vmatprep.subr.bf16.mxu0 %v2226_v9 }
 0x411   : > { %1273 = vrot.lane.b32.xlu1 %v2389_v49, %s2232_s26  ;;  %v2514_v49 = vpop.eup %2152 }
 0x412   : > { %v996_v35 = vsel %vm546_vm3, %v2514_v49, 0.0 }
 0x41a   : > { %1225 = vrot.lane.b32.xlu0 %v2383_v45, %s2232_s26  ;;  %v2516_v45 = vpop.eup %2154 }
 0x41b   : > { %v2520_v44 = vpop.eup %2156  ;;  %v999_v51 = vsel %vm546_vm3, %v2516_v45, 0.0 }
 0x41c   : > { %v1002_v48 = vsel %vm546_vm3, %v2520_v44, 0.0  ;;  %v2526_v52 = vpop.eup %2158 }
 0x41d   : > { %v1005_v53 = vsel %vm546_vm3, %v2526_v52, 0.0 }
 0x435   : > { %997 = vadd.xlane.f32.xlu1 %v996_v35 }
 0x438   : > { %v986_v46 = vpop.xlane.xlu1 %985  ;;  %v989_v47 = vpop.xlane.xlu0 %988 }
 0x439   : > { %2160 = vrcp.f32 %v986_v46  ;;  %1003 = vadd.xlane.f32.xlu1 %v1002_v48  ;;  %1000 = vadd.xlane.f32.xlu0 %v999_v51  ;;  %v2132_v48 = vld [vmem:[%s2313_s21] sm:$0xff]  }
 0x43a   : > { %2162 = vrcp.f32 %v989_v47 }
 0x43d   : > { %1006 = vadd.xlane.f32.xlu0 %v1005_v53 }
 0x443   : > { %v2161_v54 = vpop.eup %2160 }
 0x444   : > { %v2163_v55 = vpop.eup %2162  ;;  %v1016_v56 = vmul.f32 %v2161_v54, %v2145_v14 }
 0x445   : > { %v1017_v57 = vmul.f32 %v2163_v55, %v2147_v15  ;;  %v2133_v55 = vld [vmem:[%s2313_s21 + $0x8] sm:$0xff]  }
 0x446   : > { %v1024_v58 = vpack.c.bf16 %v1016_v56, %v1016_v56 }
 0x447   : > { %v1025_v59 = vpack.c.bf16 %v1017_v57, %v1017_v57 }
 0x448   : > { %2001 = vmatmul.mubr.msk.bf16.vlgmr.msra.gmra.mrb[16].mxu1 %vm546_vm3, %v1024_v58 }
 0x449   : > { %2007 = vmatmul.mubr.msk.bf16.vlgmr.msra.gmra.mrb[20].mxu0 %vm546_vm3, %v1025_v59  ;;  %2011 = vmatpush3.bf16.msra.mxu1 %v1135_v60 }
 0x44a   : > { %2017 = vmatpush3.bf16.msra.mxu0 %v1183_v61  ;;  %1369 = vrot.lane.b32.xlu1 %v2397_v50, %s2232_s26 }
 0x44b   : > { %2012 = vmatprep.mubr.msk.bf16.mxu1 %vm2227_vm2, %v2226_v9  ;;  %2022 = vmatprep.subr.bf16.mxu1 %v2226_v9 }
 0x44c   : > { %2018 = vmatprep.mubr.msk.bf16.mxu0 %vm2227_vm2, %v2226_v9  ;;  %2028 = vmatprep.subr.bf16.mxu0 %v2226_v9 }
 0x453   : > { %1321 = vrot.lane.b32.xlu0 %v2370_v36, %s2232_s26 }
 0x48d   : > { %v992_v62 = vpop.xlane.xlu1 %991 }
 0x48e   : > { %2164 = vrcp.f32 %v992_v62 }
 0x491   : > { %v995_v63 = vpop.xlane.xlu0 %994  ;;  %v1274_v10 = vpop.permute.xlu1 %1273 }
 0x492   : > { %2166 = vrcp.f32 %v995_v63  ;;  %v1279_v11 = vsel %vm1037_vm4, %v1274_v10, 0 }
 0x495   : > { %v1226_v1 = vpop.permute.xlu0 %1225 }
 0x496   : > { %v1231_v8 = vsel %vm1037_vm4, %v1226_v1, 0 }
 0x498   : > { %v2165_v0 = vpop.eup %2164 }
 0x499   : > { %v1018_v50 = vmul.f32 %v2165_v0, %v2498_v19 }
 0x49b   : > { %v1026_v4 = vpack.c.bf16 %v1018_v50, %v1018_v50 }
 0x49c   : > { %v2167_v6 = vpop.eup %2166 }
 0x49d   : > { %v1019_v7 = vmul.f32 %v2167_v6, %v2502_v23  ;;  %2013 = vmatmul.mubr.msk.bf16.vlgmr.msra.gmra.mrb[20].mxu1 %vm546_vm3, %v1026_v4 }
 0x49e   : > { %2023 = vmatpush3.bf16.msra.mxu1 %v1231_v8  ;;  %2024 = vmatprep.mubr.msk.bf16.mxu1 %vm2227_vm2, %v2226_v9 }
 0x49f   : > { %v1027_v36 = vpack.c.bf16 %v1019_v7, %v1019_v7  ;;  %2034 = vmatprep.subr.bf16.mxu1 %v2226_v9 }
 0x4a1   : > { %2019 = vmatmul.mubr.msk.bf16.vlgmr.msra.gmra.mrb[24].mxu0 %vm546_vm3, %v1027_v36 }
 0x4a2   : > { %2029 = vmatpush3.bf16.msra.mxu0 %v1279_v11  ;;  %2030 = vmatprep.mubr.msk.bf16.mxu0 %vm2227_vm2, %v2226_v9 }
 0x4a3   : > { %2040 = vmatprep.subr.bf16.mxu0 %v2226_v9 }
 0x4c2   : > { %v998_v12 = vpop.xlane.xlu1 %997 }
 0x4c3   : > { %2168 = vrcp.f32 %v998_v12 }
 0x4c6   : > { %v1004_v14 = vpop.xlane.xlu1 %1003  ;;  %v1001_v15 = vpop.xlane.xlu0 %1000 }
 0x4c7   : > { %2170 = vrcp.f32 %v1004_v14 }
 0x4c8   : > { %2172 = vrcp.f32 %v1001_v15 }
 0x4ca   : > { %v1007_v16 = vpop.xlane.xlu0 %1006  ;;  %v1370_v22 = vpop.permute.xlu1 %1369 }
 0x4cb   : > { %2174 = vrcp.f32 %v1007_v16  ;;  %v1375_v25 = vsel %vm1037_vm4, %v1370_v22, 0 }
 0x4cd   : > { %v2169_v38 = vpop.eup %2168 }
 0x4ce   : > { %v1020_v40 = vmul.f32 %v2169_v38, %v2514_v49  ;;  %v1322_v31 = vpop.permute.xlu0 %1321 }
 0x4cf   : > { %v1327_v13 = vsel %vm1037_vm4, %v1322_v31, 0 }
 0x4d0   : > { %v1028_v17 = vpack.c.bf16 %v1020_v40, %v1020_v40 }
 0x4d1   : > { %v2171_v18 = vpop.eup %2170 }
 0x4d2   : > { %v2173_v5 = vpop.eup %2172  ;;  %2025 = vmatmul.mubr.msk.bf16.vlgmr.msra.gmra.mrb[24].mxu1 %vm546_vm3, %v1028_v17  ;;  %v1022_v21 = vmul.f32 %v2171_v18, %v2520_v44 }
 0x4d3   : > { %v1021_v19 = vmul.f32 %v2173_v5, %v2516_v45  ;;  %2035 = vmatpush3.bf16.msra.mxu1 %v1327_v13  ;;  %2036 = vmatprep.mubr.msk.bf16.mxu1 %vm2227_vm2, %v2226_v9 }
 0x4d4   : > { %2046 = vmatprep.subr.bf16.mxu1 %v2226_v9  ;;  %v1030_v20 = vpack.c.bf16 %v1022_v21, %v1022_v21 }
 0x4d5   : > { %v1029_v23 = vpack.c.bf16 %v1021_v19, %v1021_v19  ;;  %v2175_v24 = vpop.eup %2174 }
 0x4d6   : > { %v1023_v26 = vmul.f32 %v2175_v24, %v2526_v52 }
 0x4d7   : > { %2031 = vmatmul.mubr.msk.bf16.vlgmr.msra.gmra.mrb[28].mxu0 %vm546_vm3, %v1029_v23 }
 0x4d8   : > { %2041 = vmatpush3.bf16.msra.mxu0 %v1375_v25  ;;  %2042 = vmatprep.mubr.msk.bf16.mxu0 %vm2227_vm2, %v2226_v9  ;;  %v1031_v27 = vpack.c.bf16 %v1023_v26, %v1023_v26 }
 0x4d9   : > { %2054 = vmatprep.subr.bf16.mxu0 %v2226_v9 }
 0x4da   : > { %2037 = vmatmul.mubr.msk.bf16.vlgmr.msra.gmra.mrb[28].mxu1 %vm546_vm3, %v1030_v20 }
 0x4db   : > { %2050 = vmatprep.mubr.msk.bf16.mxu1 %vm2227_vm2, %v2226_v9  ;;  %2047 = vmatpush3.bf16.msra.mxu1 %v2132_v48  ;;  %v2137_v48 = vld [vmem:[%s2328_s13 + $0x8] sm:$0xff]  }
 0x4dc   : > { %2048 = vmatprep.subr.bf16.mxu1 %v2226_v9 }
 0x4df   : > { %2043 = vmatmul.mubr.msk.bf16.vlgmr.msra.gmra.mrb[32].mxu0 %vm546_vm3, %v1031_v27  ;;  %2049 = vmatpush3.bf16.msra.mxu1 %v2133_v55 }
 0x4e0   : > { %2058 = vmatprep.mubr.msk.bf16.mxu0 %vm2227_vm2, %v2226_v9  ;;  %2062 = vmatprep.subr.bf16.mxu1 %v2226_v9 }
 0x51b   : > { %v1075_v28 = vpop.f32.mrb[16].mxu1 }
 0x51c   : > { %v1123_v29 = vpop.f32.mrb[20].mxu0  ;;  %v2002_v30 = vpop.f32.mrb[17].mxu1 }
 0x51d   : > { %v2008_v32 = vpop.f32.mrb[21].mxu0  ;;  %v1078_v33 = vpop.f32.mrb[18].mxu1  ;;  %v2135_v30 = vld [vmem:[%s2322_s27 + $0x8] sm:$0xff]  }
 0x51e   : > { %v1126_v34 = vpop.f32.mrb[22].mxu0  ;;  %v2003_v37 = vpop.f32.mrb[19].mxu1 }
 0x51f   : > { %v2009_v39 = vpop.f32.mrb[23].mxu0 }
 0x570   : > { %v1171_v41 = vpop.f32.mrb[20].mxu1 }
 0x571   : > { %v2014_v42 = vpop.f32.mrb[21].mxu1 }
 0x572   : > { %v1174_v49 = vpop.f32.mrb[22].mxu1 }
 0x573   : > { %v2015_v45 = vpop.f32.mrb[23].mxu1 }
 0x574   : > { %v1219_v43 = vpop.f32.mrb[24].mxu0  ;;  %v1877_v45 = vld [vmem:[%s396_s24] ss:$0 sm:$0xff] }
 0x575   : > { %v2115_v35 = vpack.i.bf16 %v1219_v43, %v1171_v41  ;;  %v2020_v44 = vpop.f32.mrb[25].mxu0 }
 0x576   : > { %v1222_v46 = vpop.f32.mrb[26].mxu0 }
 0x577   : > { %2116 = vrot.lane.b32.xlu0 %v2115_v35, %s2233_s16  ;;  %v2021_v47 = vpop.f32.mrb[27].mxu0 }
 0x578   : > { %v2136_v47 = vld [vmem:[%s2328_s13] sm:$0xff]  }
 0x5a5   : > { %v1267_v51 = vpop.f32.mrb[24].mxu1 }
 0x5a6   : > { %v2026_v52 = vpop.f32.mrb[25].mxu1 }
 0x5a7   : > { %v1270_v53 = vpop.f32.mrb[26].mxu1  ;;  %v2139_v52 = vld [vmem:[%s2328_s13 + $0x18] sm:$0xff]  }
 0x5a8   : > { %v2027_v54 = vpop.f32.mrb[27].mxu1 }
 0x5aa   : > { %v1315_v56 = vpop.f32.mrb[28].mxu0 }
 0x5ab   : > { %v2120_v57 = vpack.i.bf16 %v1315_v56, %v1267_v51  ;;  %v2032_v58 = vpop.f32.mrb[29].mxu0  ;;  %v2138_v51 = vld [vmem:[%s2328_s13 + $0x10] sm:$0xff]  }
 0x5ac   : > { %v1318_v59 = vpop.f32.mrb[30].mxu0 }
 0x5ad   : > { %2121 = vrot.lane.b32.xlu1 %v2120_v57, %s2234_s17  ;;  %v2033_v60 = vpop.f32.mrb[31].mxu0  ;;  %v1363_v61 = vpop.f32.mrb[28].mxu1 }
 0x5ae   : > { %v2038_v62 = vpop.f32.mrb[29].mxu1 }
 0x5af   : > { %v1366_v63 = vpop.f32.mrb[30].mxu1 }
 0x5b0   : > { %v2039_v0 = vpop.f32.mrb[31].mxu1 }
 0x5b2   : > { %v1411_v50 = vpop.f32.mrb[32].mxu0 }
 0x5b3   : > { %v2125_v1 = vpack.i.bf16 %v1411_v50, %v1363_v61  ;;  %v2044_v4 = vpop.f32.mrb[33].mxu0 }
 0x5b4   : > { %v1414_v6 = vpop.f32.mrb[34].mxu0 }
 0x5b5   : > { %2126 = vrot.lane.b32.xlu0 %v2125_v1, %s2235_s19  ;;  %v2045_v7 = vpop.f32.mrb[35].mxu0 }
 0x5e9   : > { %v2117_v8 = vpop.permute.xlu0 %2116 }
 0x5ea   : > { %v2119_v36 = vunpack.i.h.bf16 %v2117_v8  ;;  %v2118_v11 = vunpack.i.l.bf16 %v2117_v8 }
 0x5ec   : > { %v1442_v16 = vsel %vm546_vm3, %v1123_v29, %v2119_v36  ;;  %v1441_v38 = vsel %vm546_vm3, %v1075_v28, %v2118_v11 }
 0x61f   : > { %v2122_v10 = vpop.permute.xlu1 %2121 }
 0x620   : > { %v2124_v12 = vunpack.i.h.bf16 %v2122_v10  ;;  %v2123_v14 = vunpack.i.l.bf16 %v2122_v10 }
 0x622   : > { %v1445_v17 = vsel %vm1443_vm5, %v1442_v16, %v2124_v12  ;;  %v1444_v18 = vsel %vm1443_vm5, %v1441_v38, %v2123_v14 }
 0x627   : > { %v2127_v15 = vpop.permute.xlu0 %2126 }
 0x628   : > { %v2129_v40 = vunpack.i.h.bf16 %v2127_v15  ;;  %v2128_v31 = vunpack.i.l.bf16 %v2127_v15 }
 0x62a   : > { %v1448_v5 = vsel %vm1446_vm6, %v1445_v17, %v2129_v40  ;;  %v1447_v13 = vsel %vm1446_vm6, %v1444_v18, %v2128_v31 }
 0x62b   : > { %v1449_v19 = vpack.c.bf16 %v1448_v5, %v1447_v13 }
 0x62d   : > { %2051 = vmatmul.mubr.msk.bf16.vlgmr.msra.gmra.mrb[32].mxu1 %vm422_vm1, %v1449_v19 }
 0x62e   : > { %2070 = vmatprep.mubr.msk.bf16.mxu1 %vm2227_vm2, %v2226_v9  ;;  %2063 = vmatpush3.bf16.msra.mxu1 %v2136_v47 }
 0x62f   : > { %2064 = vmatprep.subr.bf16.mxu1 %v2226_v9 }
 0x632   : > { %2065 = vmatpush3.bf16.msra.mxu1 %v2137_v48 }
 0x633   : > { %2066 = vmatprep.subr.bf16.mxu1 %v2226_v9 }
 0x636   : > { %2067 = vmatpush3.bf16.msra.mxu1 %v2138_v51 }
 0x637   : > { %2068 = vmatprep.subr.bf16.mxu1 %v2226_v9 }
 0x63a   : > { %2069 = vmatpush3.bf16.msra.mxu1 %v2139_v52 }
 0x700   : > { %v1503_v21 = vpop.f32.mrb[32].mxu1 }
 0x701   : > { %v2587_v22 = vadd.f32 %v1503_v21, %v2337_v2  ;;  %v2052_v23 = vpop.f32.mrb[33].mxu1  ;;  %v2134_v2 = vld [vmem:[%s2322_s27] sm:$0xff]  }
 0x702   : > { %v1506_v24 = vpop.f32.mrb[34].mxu1  ;;  %2055 = vmatpush3.bf16.msra.mxu0 %v2134_v2  ;;  %v1887_v2 = vld [vmem:[%s2665_s8] ss:$0 sm:$0xff] (!%p1886_p5) }
 0x703   : > { %v2590_v25 = vadd.f32 %v1506_v24, %v2339_v3  ;;  %v2053_v20 = vpop.f32.mrb[35].mxu1  ;;  %v1513_v26 = vmul.f32 %v2587_v22, %v2587_v22  ;;  %2056 = vmatprep.subr.bf16.mxu0 %v2226_v9 }
 0x705   : > { %v1515_v27 = vsel %vm422_vm1, %v1513_v26, 0.0  ;;  %v1514_v28 = vmul.f32 %v2590_v25, %v2590_v25 }
 0x706   : > { %1516 = vadd.xlane.f32.xlu1 %v1515_v27  ;;  %2057 = vmatpush3.bf16.msra.mxu0 %v2135_v30 }
 0x707   : > { %v1518_v29 = vsel %vm422_vm1, %v1514_v28, 0.0 }
 0x708   : > { %1519 = vadd.xlane.f32.xlu0 %v1518_v29 }
 0x793   : > { %v1517_v3 = vpop.xlane.xlu1 %1516 }
 0x794   : > { %v1521_v32 = vmul.f32 0.03125, %v1517_v3 }
 0x795   : > { %v1520_v33 = vpop.xlane.xlu0 %1519 }
 0x796   : > { %v1523_v34 = vadd.f32 1e-06, %v1521_v32  ;;  %v1522_v37 = vmul.f32 0.03125, %v1520_v33 }
 0x798   : > { %2176 = vrsqrt.f32 %v1523_v34  ;;  %v1524_v39 = vadd.f32 1e-06, %v1522_v37 }
 0x79a   : > { %2178 = vrsqrt.f32 %v1524_v39 }
 0x7a2   : > { %v2177_v41 = vpop.eup %2176 }
 0x7a3   : > { %v1527_v42 = vmul.f32 %v2177_v41, %v2587_v22 }
 0x7a4   : > { %v2179_v49 = vpop.eup %2178 }
 0x7a5   : > { %v1528_v43 = vmul.f32 %v2179_v49, %v2590_v25  ;;  %v1535_v35 = vmul.f32 %v1877_v45, %v1527_v42 }
 0x7a7   : > { %v1536_v44 = vmul.f32 %v1877_v45, %v1528_v43 }
 0x7a9   : > { %v1537_v46 = vpack.c.bf16 %v1536_v44, %v1535_v35 }
 0x7ab   : > { %2059 = vmatmul.mubr.msk.bf16.vlgmr.msra.gmra.mrb[36].mxu0 %vm422_vm1, %v1537_v46 }
 0x87e   : > { %v1591_v53 = vpop.f32.mrb[36].mxu0 }
 0x87f   : > { %1618 = vrot.lane.b32.xlu0 %v1591_v53, %s2232_s26  ;;  %v2060_v54 = vpop.f32.mrb[37].mxu0  ;;  %v1600_v57 = vmul.f32 0.044715, %v1591_v53  ;;  %v1598_v8 = vmul.f32 0.5, %v1591_v53 }
 0x880   : > { %v1594_v55 = vpop.f32.mrb[38].mxu0 }
 0x881   : > { %1620 = vrot.lane.b32.xlu1 %v1594_v55, %s2232_s26  ;;  %v2061_v56 = vpop.f32.mrb[39].mxu0  ;;  %v1601_v58 = vmul.f32 0.044715, %v1594_v55  ;;  %v1602_v59 = vmul.f32 %v1600_v57, %v1591_v53  ;;  %v1599_v10 = vmul.f32 0.5, %v1594_v55 }
 0x883   : > { %v1603_v60 = vmul.f32 %v1601_v58, %v1594_v55  ;;  %v1604_v61 = vmul.f32 %v1602_v59, %v1591_v53 }
 0x885   : > { %v1605_v62 = vmul.f32 %v1603_v60, %v1594_v55  ;;  %v1606_v63 = vadd.f32 %v1604_v61, %v1591_v53 }
 0x887   : > { %v1607_v0 = vadd.f32 %v1605_v62, %v1594_v55  ;;  %v1608_v50 = vmul.f32 0.7978846, %v1606_v63 }
 0x889   : > { %v1609_v9 = vmul.f32 0.7978846, %v1607_v0  ;;  %2180 = vtanh.f32 %v1608_v50 }
 0x88b   : > { %2182 = vtanh.f32 %v1609_v9 }
 0x893   : > { %v2181_v1 = vpop.eup %2180 }
 0x894   : > { %v1612_v6 = vadd.f32 1.0, %v2181_v1 }
 0x895   : > { %v2183_v4 = vpop.eup %2182 }
 0x896   : > { %v1613_v7 = vadd.f32 1.0, %v2183_v4  ;;  %v1614_v11 = vmul.f32 %v1612_v6, %v1598_v8 }
 0x898   : > { %v1615_v12 = vmul.f32 %v1613_v7, %v1599_v10 }
 0x8f1   : > { %v1619_v36 = vpop.permute.xlu0 %1618 }
 0x8f2   : > { %v1624_v15 = vmul.f32 %v1619_v36, %v1614_v11 }
 0x8f3   : > { %v1621_v14 = vpop.permute.xlu1 %1620 }
 0x8f4   : > { %v1625_v16 = vmul.f32 %v1621_v14, %v1615_v12 }
 0x8f6   : > { %v1626_v38 = vpack.c.bf16 %v1625_v16, %v1624_v15 }
 0x8f8   : > { %2071 = vmatmul.mubr.msk.bf16.vlgmr.msra.gmra.mrb[36].mxu1 %vm1659_vm7, %v1626_v38 }
 0x9ca   : > { %1711 = sbr.rel (%p1886_p5) target bundleno = 2679 (0xa77), region = 64 }
 0x9cb   : > { %v1697_v40 = vpop.f32.mrb[36].mxu1 }
 0x9cc   : > { %v1704_v31 = vadd.f32 %v1697_v40, %v2587_v22  ;;  %v2072_v17 = vpop.f32.mrb[37].mxu1 }
 0x9cd   : > { %v1700_v18 = vpop.f32.mrb[38].mxu1 }
 0x9ce   : > { %1706 = vst.msk [vmem:[#allocation2] sm:$0xff] %vm422_vm1, %v1704_v31  ;;  %v1705_v5 = vadd.f32 %v1700_v18, %v2590_v25  ;;  %v2073_v13 = vpop.f32.mrb[39].mxu1  ;;  %v1713_v19 = vmul.f32 (!%p1886_p5), %v1704_v31, %v1704_v31 }
 0x9d0   : > { %1707 = vst.msk [vmem:[#allocation2 + $0x8] sm:$0xff] %vm422_vm1, %v1705_v5  ;;  %v1714_v21 = vmul.f32 (!%p1886_p5), %v1705_v5, %v1705_v5  ;;  %v1715_v23 = vsel (!%p1886_p5), %vm422_vm1, %v1713_v19, 0.0 }
 0x9d1   : > { %1716 = vadd.xlane.f32.xlu0 %v1715_v23 }
 0x9d2   : > { %v1718_v24 = vsel %vm422_vm1, %v1714_v21, 0.0 }
 0x9d5   : > { %1719 = vadd.xlane.f32.xlu0 %v1718_v24 }
 0xa5e   : > { %v1717_v22 = vpop.xlane.xlu0 %1716 }
 0xa5f   : > { %v1721_v20 = vmul.f32 0.03125, %v1717_v22 }
 0xa61   : > { %v1723_v26 = vadd.f32 1e-06, %v1721_v20 }
 0xa62   : > { %v1720_v27 = vpop.xlane.xlu0 %1719 }
 0xa63   : > { %2184 = vrsqrt.f32 %v1723_v26  ;;  %v1722_v25 = vmul.f32 0.03125, %v1720_v27 }
 0xa65   : > { %v1724_v28 = vadd.f32 1e-06, %v1722_v25 }
 0xa67   : > { %2186 = vrsqrt.f32 %v1724_v28 }
 0xa6d   : > { %v2185_v29 = vpop.eup %2184 }
 0xa6e   : > { %v1727_v30 = vmul.f32 %v2185_v29, %v1704_v31 }
 0xa70   : > { %v1735_v3 = vmul.f32 %v1887_v2, %v1727_v30 }
 0xa71   : > { %v2187_v32 = vpop.eup %2186 }
 0xa72   : > { %1737 = vst.msk [vmem:[#allocation3] sm:$0xff] %vm422_vm1, %v1735_v3  ;;  %v1728_v33 = vmul.f32 %v2187_v32, %v1705_v5 }
 0xa74   : > { %v1736_v34 = vmul.f32 %v1887_v2, %v1728_v33 }
 0xa76   : > { %1738 = vst.msk [vmem:[#allocation3 + $0x8] sm:$0xff] %vm422_vm1, %v1736_v34 }
 0xa77 PF: > { %p2078_p6 = scmp.eq.s32.totalorder %s2294_s10, 1  ;;  %s2236_s13 = smov [#allocation3]  }
 0xa78   : > { %s1745_s26 = sshll.u32 %s2236_s13, 4  ;;  %s1746_s26 = int_to_ptr.vmem [resolvable:$true] %s1745_s26 }
 0xa79   : > { %s2188_s20 = scalar_lea.vmem %s1746_s26, 256  ;;  %p2195_p10 = scmp.lt.s32.totalorder %s1746_s26, %s1746_s26 }
 0xa7a   : > { %p2189_p7 = scmp.ne.s32.totalorder %s1746_s26, %s2188_s20  ;;  %p2196_p11 = scmp.lt.s32.totalorder %s2188_s20, %s2188_s20 }
 0xa7c   : > { %p2190_p8 = pnand %p2189_p7, %p2078_p6  ;;  %p2197_p12 = por %p2196_p11, %p2195_p10 }
 0xa7e   : > { %p2191_p9 = pneg %p2190_p8 }
 0xa80   : > { %p2198_p13 = pnand %p2197_p12, %p2191_p9 }
 0xa82   : > { %2201 = shalt.err (!%p2198_p13)
}
 0xa83   : > { %s2202_s22 = scalar_lea.hbm %s2666_s9, 256 }
 0xa84   : > { %p2203_p0 = scmp.ne.s32.totalorder %s2666_s9, %s2202_s22  ;;  %p2208_p3 = scmp.lt.u32.totalorder %s2202_s22, %s2666_s9 }
 0xa86   : > { %p2204_p1 = pnand %p2203_p0, %p2078_p6 }
 0xa88   : > { %p2205_p2 = pneg %p2204_p1 }
 0xa8a   : > { %p2210_p4 = pnand %p2208_p3, %p2205_p2 }
 0xa8c   : > { %2213 = shalt.err (!%p2210_p4)
}
 0xa8d   : > { %s2237_s29 = smov 128  }
 0xa8e   : > { %2075 = dma.vmem_to_hbm [thread:$0]  (%p2078_p6), %s1746_s26, 256, %s2666_s9, [#allocation4], %s2237_s29, %s2237_s29, %s2233_s16  }
 0xa8f   : > { %2219 = dma.done.wait (%p2078_p6), [#allocation4], 256  }
 0xa90   : > { %2221 = vsyncadd (%p2078_p6), [#allocation4], 4294967040 }
 0xa91 PF: > { %s20_s30 = sadd.s32 1, %s2224_s30  }
 0xa92   : > { %p17_p5 = scmp.ge.s32.totalorder %s20_s30, 4  }
 0xa94   :  { %19 = sbr.rel (!%p17_p5) target bundleno = 1 (0x1), region = 106 }
 0xa9b   :  { %1761 = vsyncpa [#allocation4], 1 }
 0xa9c   :  { %1763 = vsyncpa [#allocation4 + $0x1], 1 }

// kernel: frozen_clip_t5_encode.2
= control target key start
LH: loop header
LB: loop body
LE: loop exit
PB: predicated region body
PF: predicated region fallthrough
CT: control target
= control target key end

     0   :  { %s3150_s0 = inlined_call_operand.vmem [shape: f32[16,32], index: 0, kind: input, shape index: {}]   ;;  %s3151_s1 = inlined_call_operand.vmem [shape: f32[2,1,32], index: 1, kind: input, shape index: {}]   ;;  %s3152_s2 = inlined_call_operand.vmem [shape: f32[2,1,32], index: 2, kind: input, shape index: {}]   ;;  %s3153_s3 = inlined_call_operand.vmem [shape: bf16[2,32,96], index: 3, kind: input, shape index: {}]   ;;  %s3154_s4 = inlined_call_operand.vmem [shape: f32[2,1,96], index: 4, kind: input, shape index: {}]   ;;  %s3155_s5 = inlined_call_operand.vmem [shape: bf16[2,32,32], index: 5, kind: input, shape index: {}]   ;;  %s3156_s6 = inlined_call_operand.vmem [shape: f32[2,1,32], index: 6, kind: input, shape index: {}]   ;;  %s3157_s7 = inlined_call_operand.vmem [shape: f32[2,1,32], index: 7, kind: input, shape index: {}]   ;;  %s3158_s8 = inlined_call_operand.vmem [shape: f32[2,1,32], index: 8, kind: input, shape index: {}]   ;;  %s3159_s9 = inlined_call_operand.vmem [shape: bf16[2,32,64], index: 9, kind: input, shape index: {}]   ;;  %s3160_s10 = inlined_call_operand.vmem [shape: f32[2,1,64], index: 10, kind: input, shape index: {}]   ;;  %s3161_s11 = inlined_call_operand.vmem [shape: bf16[2,64,32], index: 11, kind: input, shape index: {}]   ;;  %s3162_s12 = inlined_call_operand.vmem [shape: f32[2,1,32], index: 12, kind: input, shape index: {}]   ;;  %s3163_s13 = inlined_call_operand.vmem [shape: f32[1,32], index: 13, kind: input, shape index: {}]   ;;  %s3164_s14 = inlined_call_operand.vmem [shape: f32[1,32], index: 14, kind: input, shape index: {}]   ;;  %s3165_s15 = inlined_call_operand.hbm [shape: f32[16,32], index: 15, kind: output, shape index: {}]  }
   0x1   :  { %3169 = sst [smem:[#allocation8_spill]] %s3153_s3 }
   0x2   :  { %3170 = sst [smem:[#allocation9_spill]] %s3155_s5 }
   0x3   :  { %3171 = sst [smem:[#allocation10_spill]] %s3163_s13 }
   0x4   :  { %3172 = sst [smem:[#allocation11_spill]] %s3164_s14 }
   0x5   :  { %3173 = sst [smem:[#allocation12_spill]] %s3165_s15 }
   0x6   :  { %20 = vsyncpa [#allocation4], 0  ;;  %s2714_s18 = smov 0  }
   0x7 LB: > { %3174 = sst [smem:[#allocation6_spill]] %s2620_s18  ;;  %s2720_s19 = sadd.s32 4294967295, %s2620_s18   ;;  %s2620_s18 = sphi %s2714_s18, %s26_s18  }
   0x8   : > { %p2242_p0 = scmp.ge.s32.totalorder %s2620_s18, 1  ;;  %p527_p1 = scmp.lt.s32.totalorder %s2620_s18, 3 }
   0xa   : > { %p528_p2 = pnand %p2242_p0, %p527_p1 }
   0xc   : > { %531 = sbr.rel (%p528_p2) target bundleno = 3083 (0xc0b), region = 80 }
  0x13   : > { %p609_p3 = scmp.lt.s32.totalorder %s2720_s19, 1  ;;  %s3175_s3 = sld [smem:[#allocation8_spill]] }
  0x14   : > { %s3176_s5 = sld [smem:[#allocation9_spill]]  ;;  %p2251_p4 = scmp.ne.s32.totalorder %s2720_s19, 0 }
  0x15   : > { %s2726_s20 = scalar_select %p609_p3, %s2720_s19, 1 }
  0x16   : > { %657 = sbr.rel (%p2251_p4) target bundleno = 29 (0x1d), region = 84  ;;  %v658_v0 = vld [vmem:[%s3150_s0] sm:$0xff] (!%p2251_p4)  ;;  %vm660_vm0 = vcmask (!%p2251_p4), 261120   ;;  %v659_v1 = vld [vmem:[%s3150_s0 + $0x8] sm:$0xff] (!%p2251_p4) }
  0x17   : > { %s2299_s27 = sshll.u32 %s2726_s20, 4  ;;  %s633_s13 = scalar_lea.vmem %s3157_s7, %s2726_s20  ;;  %661 = vst.msk [vmem:[#allocation2] sm:$0xff] (!%p2251_p4), %vm660_vm0, %v658_v0  ;;  %662 = vst.msk [vmem:[#allocation2 + $0x8] sm:$0xff] (!%p2251_p4), %vm660_vm0, %v659_v1 }
  0x18   : > { %s636_s30 = scalar_lea.vmem %s3158_s8, %s2726_s20  ;;  %s652_s28 = scalar_lea.vmem %s3162_s12, %s2726_s20 }
  0x19   : > { %s2744_s21 = scalar_lea.vmem %s3175_s3, %s2299_s27  ;;  %s2766_s3 = scalar_lea.vmem %s3159_s9, %s2299_s27 }
  0x1a   : > { %s2749_s15 = scalar_lea.vmem %s3176_s5, %s2299_s27  ;;  %s644_s5 = scalar_lea.vmem %s3160_s10, %s2726_s20 }
  0x1b   : > { %3177 = sst [smem:[#allocation7_spill]] %s2749_s15  ;;  %s2302_s15 = sshll.u32 %s2726_s20, 5 }
  0x1c   : > { %s2776_s24 = scalar_lea.vmem %s3161_s11, %s2302_s15 }
  0x1d PF: > { %vm667_vm1 = vcmask 261120   ;;  %v2522_v16 = vld [vmem:[%s2744_s21] sm:$0xff]   ;;  %v2622_v17 = vmov 0.0   ;;  %v2523_v18 = vld [vmem:[%s2744_s21 + $0x8] sm:$0xff]   ;;  %vm2623_vm2 = vmmov 0   ;;  %s3178_s18 = scalar_lea.vmem %s3151_s1, %s2726_s20  ;;  %s3179_s23 = scalar_lea.vmem %s3152_s2, %s2726_s20  ;;  %vm831_vm3 = vcmask 64512  }
  0x1e   : > { %v2789_v2 = vld [vmem:[#allocation2] sm:$0xff]  ;;  %v2791_v3 = vld [vmem:[#allocation2 + $0x8] sm:$0xff]  ;;  %2349 = vmatprep.subr.bf16.mxu0 %v2622_v17  ;;  %2357 = vmatprep.subr.bf16.mxu1 %v2622_v17  ;;  %s3180_s29 = scalar_lea.vmem %s3154_s4, %s2726_s20  ;;  %s2624_s27 = smov 120   ;;  %vm1332_vm5 = vcmask 1043456   ;;  %vm1738_vm6 = vcmask 130048   ;;  %vm1741_vm7 = vcmask 195584  }
  0x1f   : > { %v668_v4 = vsel %vm667_vm1, %v2789_v2, 0.0  ;;  %v671_v5 = vsel %vm667_vm1, %v2791_v3, 0.0  ;;  %2350 = vmatpush3.bf16.msra.mxu0 %v2522_v16  ;;  %2353 = vmatprep.mubr.msk.bf16.mxu0 %vm2623_vm2, %v2622_v17  ;;  %v2252_v27 = vld [vmem:[%s3178_s18] ss:$0 sm:$0xff]  ;;  %s2625_s16 = smov 104   ;;  %s2626_s17 = smov 112  }
  0x20   : > { %669 = vadd.xlane.f32.xlu0 %v668_v4  ;;  %2351 = vmatprep.subr.bf16.mxu0 %v2622_v17  ;;  %v2253_v31 = vld [vmem:[%s3179_s23] ss:$0 sm:$0xff]  ;;  %s2627_s15 = smov 96   ;;  %s2628_s21 = smov 64   ;;  %vm1984_vm8 = vcmask 523264  }
  0x21   : > { %2359 = vmatprep.mubr.msk.bf16.mxu1 %vm2623_vm2, %v2622_v17  ;;  %v2254_v36 = vld [vmem:[%s3180_s29] ss:$0 sm:$0xff]  ;;  %s3183_s18 = sld [smem:[#allocation7_spill]]  ;;  %s2629_s22 = smov 8  }
  0x22   : > { %s2630_s14 = smov 16   ;;  %s2631_s23 = smov 24  }
  0x23   : > { %2352 = vmatpush3.bf16.msra.mxu0 %v2523_v18  ;;  %s3184_s29 = scalar_lea.vmem %s3156_s6, %s2726_s20  ;;  %p2292_p5 = scmp.ne.s32.totalorder %s2720_s19, 1 }
  0x24   : > { %672 = vadd.xlane.f32.xlu0 %v671_v5  ;;  %2363 = vmatprep.subr.bf16.mxu0 %v2622_v17 }
  0xad   : > { %v670_v6 = vpop.xlane.xlu0 %669 }
  0xae   : > { %v675_v7 = vmul.f32 0.03125, %v670_v6 }
  0xb0   : > { %v677_v8 = vsub.f32 %v2789_v2, %v675_v7 }
  0xb1   : > { %v673_v9 = vpop.xlane.xlu0 %672 }
  0xb2   : > { %v676_v10 = vmul.f32 0.03125, %v673_v9  ;;  %v679_v11 = vmul.f32 %v677_v8, %v677_v8 }
  0xb4   : > { %v678_v12 = vsub.f32 %v2791_v3, %v676_v10  ;;  %v681_v13 = vsel %vm667_vm1, %v679_v11, 0.0 }
  0xb5   : > { %682 = vadd.xlane.f32.xlu1 %v681_v13 }
  0xb6   : > { %v680_v14 = vmul.f32 %v678_v12, %v678_v12 }
  0xb8   : > { %v684_v15 = vsel %vm667_vm1, %v680_v14, 0.0 }
  0xb9   : > { %685 = vadd.xlane.f32.xlu1 %v684_v15 }
 0x142   : > { %v683_v19 = vpop.xlane.xlu1 %682 }
 0x143   : > { %v687_v20 = vmul.f32 0.03125, %v683_v19 }
 0x145   : > { %v689_v21 = vadd.f32 1e-05, %v687_v20 }
 0x146   : > { %v686_v22 = vpop.xlane.xlu1 %685 }
 0x147   : > { %2532 = vrsqrt.f32 %v689_v21  ;;  %v688_v23 = vmul.f32 0.03125, %v686_v22 }
 0x149   : > { %v690_v24 = vadd.f32 1e-05, %v688_v23 }
 0x14b   : > { %2534 = vrsqrt.f32 %v690_v24 }
 0x151   : > { %v2533_v25 = vpop.eup %2532 }
 0x152   : > { %v693_v26 = vmul.f32 %v2533_v25, %v677_v8 }
 0x154   : > { %v701_v30 = vmul.f32 %v2252_v27, %v693_v26 }
 0x155   : > { %v2535_v28 = vpop.eup %2534 }
 0x156   : > { %v694_v29 = vmul.f32 %v2535_v28, %v678_v12  ;;  %v709_v33 = vadd.f32 %v2253_v31, %v701_v30  ;;  %v807_v28 = vlaneseq }
 0x158   : > { %v702_v32 = vmul.f32 %v2252_v27, %v694_v29  ;;  %v808_v29 = vshrl.u32 %v807_v28, 7  ;;  %v810_v30 = vand.u32 127, %v807_v28 }
 0x15a   : > { %v710_v34 = vadd.f32 %v2253_v31, %v702_v32  ;;  %vm2906_vm4 = vcmp.le.s32.totalorder %v810_v30, %v808_v29 }
 0x15c   : > { %v711_v35 = vpack.c.bf16 %v710_v34, %v709_v33 }
 0x15e   : > { %2354 = vmatmul.mubr.msk.bf16.vlgmr.msra.gmra.mrb[0].mxu0 %vm667_vm1, %v711_v35 }
 0x15f   : > { %2365 = vmatprep.mubr.msk.bf16.mxu0 %vm2623_vm2, %v2622_v17 }
 0x231   : > { %v772_v37 = vpop.f32.mrb[0].mxu0 }
 0x232   : > { %v773_v38 = vadd.f32 %v2254_v36, %v772_v37  ;;  %v2355_v39 = vpop.f32.mrb[1].mxu0 }
 0x233   : > { %v775_v40 = vpop.f32.mrb[2].mxu0 }
 0x234   : > { %v776_v41 = vadd.f32 %v2254_v36, %v775_v40  ;;  %781 = vrot.lane.b32.xlu0 %v773_v38, %s2624_s27  ;;  %v2356_v42 = vpop.f32.mrb[3].mxu0  ;;  %v2829_v43 = vpack.c.bf16 %v773_v38, %v773_v38  ;;  %v799_v57 = vmul.f32 0.35355338, %v773_v38 }
 0x236   : > { %783 = vrot.lane.b32.xlu1 %v776_v41, %s2624_s27  ;;  %v2833_v44 = vpack.c.bf16 %v776_v41, %v776_v41  ;;  %v812_v60 = vpack.c.bf16 %v799_v57, %v799_v57  ;;  %v800_v63 = vmul.f32 0.35355338, %v776_v41 }
 0x238   : > { %793 = vrot.lane.b32.xlu0 %v773_v38, %s2625_s16  ;;  %v813_v0 = vpack.c.bf16 %v800_v63, %v800_v63 }
 0x23a   : > { %787 = vrot.lane.b32.xlu1 %v773_v38, %s2626_s17 }
 0x23c   : > { %829 = vrot.lane.b32.xlu0 %v2829_v43, %s2627_s15 }
 0x23e   : > { %789 = vrot.lane.b32.xlu1 %v776_v41, %s2626_s17 }
 0x242   : > { %795 = vrot.lane.b32.xlu1 %v776_v41, %s2625_s16 }
 0x246   : > { %879 = vrot.lane.b32.xlu1 %v2833_v44, %s2627_s15 }
 0x2a6   : > { %v782_v45 = vpop.permute.xlu0 %781 }
 0x2a7   : > { %v2837_v46 = vpack.c.bf16 %v782_v45, %v782_v45  ;;  %v801_v6 = vmul.f32 0.35355338, %v782_v45 }
 0x2a8   : > { %v784_v47 = vpop.permute.xlu1 %783 }
 0x2a9   : > { %v2839_v48 = vpack.c.bf16 %v784_v47, %v784_v47  ;;  %928 = vrot.lane.b32.xlu0 %v2837_v46, %s2627_s15  ;;  %v802_v8 = vmul.f32 0.35355338, %v784_v47  ;;  %v814_v10 = vpack.c.bf16 %v801_v6, %v801_v6 }
 0x2aa   : > { %v2843_v49 = vpop.permute.xlu0 %793 }
 0x2ab   : > { %977 = vrot.lane.b32.xlu1 %v2839_v48, %s2627_s15  ;;  %v2854_v55 = vpack.c.bf16 %v2843_v49, %v2843_v49  ;;  %v815_v11 = vpack.c.bf16 %v802_v8, %v802_v8  ;;  %v805_v23 = vmul.f32 0.35355338, %v2843_v49 }
 0x2ac   : > { %v788_v50 = vpop.permute.xlu1 %787 }
 0x2ad   : > { %v2847_v51 = vpack.c.bf16 %v788_v50, %v788_v50  ;;  %v803_v14 = vmul.f32 0.35355338, %v788_v50  ;;  %v818_v26 = vpack.c.bf16 %v805_v23, %v805_v23 }
 0x2ae   : > { %v830_v52 = vpop.permute.xlu0 %829 }
 0x2af   : > { %1026 = vrot.lane.b32.xlu0 %v2847_v51, %s2627_s15  ;;  %v836_v53 = vsel %vm831_vm3, %v830_v52, 0  ;;  %v816_v19 = vpack.c.bf16 %v803_v14, %v803_v14 }
 0x2b0   : > { %2358 = vmatpush3.bf16.xpose.msra.mxu1 %v836_v53  ;;  %v790_v54 = vpop.permute.xlu1 %789 }
 0x2b1   : > { %v2856_v56 = vpack.c.bf16 %v790_v54, %v790_v54  ;;  %2369 = vmatprep.subr.bf16.mxu1 %v2622_v17  ;;  %v804_v16 = vmul.f32 0.35355338, %v790_v54 }
 0x2b3   : > { %1124 = vrot.lane.b32.xlu0 %v2854_v55, %s2627_s15  ;;  %1075 = vrot.lane.b32.xlu1 %v2856_v56, %s2627_s15  ;;  %v817_v21 = vpack.c.bf16 %v804_v16, %v804_v16 }
 0x2b4   : > { %v796_v58 = vpop.permute.xlu1 %795 }
 0x2b5   : > { %v2863_v59 = vpack.c.bf16 %v796_v58, %v796_v58  ;;  %v806_v25 = vmul.f32 0.35355338, %v796_v58 }
 0x2b7   : > { %2360 = vmatmul.mubr.msk.bf16.vlgmr.msra.gmra.mrb[0].mxu1 %vm831_vm3, %v812_v60  ;;  %1173 = vrot.lane.b32.xlu1 %v2863_v59, %s2627_s15  ;;  %v819_v27 = vpack.c.bf16 %v806_v25, %v806_v25  ;;  %s3185_s15 = sld [smem:[#allocation10_spill]] (!%p2292_p5) }
 0x2b8   : > { %v880_v61 = vpop.permute.xlu1 %879  ;;  %2371 = vmatprep.mubr.msk.bf16.mxu1 %vm2623_vm2, %v2622_v17 }
 0x2b9   : > { %v885_v62 = vsel %vm831_vm3, %v880_v61, 0 }
 0x2ba   : > { %2364 = vmatpush3.bf16.xpose.msra.mxu0 %v885_v62 }
 0x2bb   : > { %2375 = vmatprep.subr.bf16.mxu0 %v2622_v17 }
 0x2c1   : > { %2366 = vmatmul.mubr.msk.bf16.vlgmr.msra.gmra.mrb[4].mxu0 %vm831_vm3, %v813_v0 }
 0x2c2   : > { %2377 = vmatprep.mubr.msk.bf16.mxu0 %vm2623_vm2, %v2622_v17 }
 0x31b   : > { %v929_v1 = vpop.permute.xlu0 %928 }
 0x31c   : > { %v934_v4 = vsel %vm831_vm3, %v929_v1, 0 }
 0x31d   : > { %2370 = vmatpush3.bf16.xpose.msra.mxu1 %v934_v4  ;;  %v978_v5 = vpop.permute.xlu1 %977 }
 0x31e   : > { %v983_v7 = vsel %vm831_vm3, %v978_v5, 0  ;;  %2381 = vmatprep.subr.bf16.mxu1 %v2622_v17 }
 0x31f   : > { %2376 = vmatpush3.bf16.xpose.msra.mxu0 %v983_v7 }
 0x320   : > { %2387 = vmatprep.subr.bf16.mxu0 %v2622_v17 }
 0x321   : > { %v1027_v9 = vpop.permute.xlu0 %1026 }
 0x322   : > { %v1032_v12 = vsel %vm831_vm3, %v1027_v9, 0 }
 0x324   : > { %2372 = vmatmul.mubr.msk.bf16.vlgmr.msra.gmra.mrb[4].mxu1 %vm831_vm3, %v814_v10 }
 0x325   : > { %2382 = vmatpush3.bf16.xpose.msra.mxu1 %v1032_v12  ;;  %v1076_v13 = vpop.permute.xlu1 %1075  ;;  %2383 = vmatprep.mubr.msk.bf16.mxu1 %vm2623_vm2, %v2622_v17  ;;  %v1125_v18 = vpop.permute.xlu0 %1124 }
 0x326   : > { %v1081_v15 = vsel %vm831_vm3, %v1076_v13, 0  ;;  %2378 = vmatmul.mubr.msk.bf16.vlgmr.msra.gmra.mrb[8].mxu0 %vm831_vm3, %v815_v11  ;;  %2393 = vmatprep.subr.bf16.mxu1 %v2622_v17  ;;  %v1130_v22 = vsel %vm831_vm3, %v1125_v18, 0 }
 0x327   : > { %2388 = vmatpush3.bf16.xpose.msra.mxu0 %v1081_v15  ;;  %2389 = vmatprep.mubr.msk.bf16.mxu0 %vm2623_vm2, %v2622_v17 }
 0x328   : > { %2399 = vmatprep.subr.bf16.mxu0 %v2622_v17 }
 0x329   : > { %v1174_v20 = vpop.permute.xlu1 %1173 }
 0x32a   : > { %v1179_v24 = vsel %vm831_vm3, %v1174_v20, 0 }
 0x32c   : > { %2384 = vmatmul.mubr.msk.bf16.vlgmr.msra.gmra.mrb[8].mxu1 %vm831_vm3, %v816_v19 }
 0x32d   : > { %2394 = vmatpush3.bf16.xpose.msra.mxu1 %v1130_v22  ;;  %2395 = vmatprep.mubr.msk.bf16.mxu1 %vm2623_vm2, %v2622_v17 }
 0x32e   : > { %2390 = vmatmul.mubr.msk.bf16.vlgmr.msra.gmra.mrb[12].mxu0 %vm831_vm3, %v817_v21  ;;  %2405 = vmatprep.subr.bf16.mxu1 %v2622_v17 }
 0x32f   : > { %2400 = vmatpush3.bf16.xpose.msra.mxu0 %v1179_v24  ;;  %2401 = vmatprep.mubr.msk.bf16.mxu0 %vm2623_vm2, %v2622_v17 }
 0x330   : > { %2411 = vmatprep.subr.bf16.mxu0 %v2622_v17 }
 0x334   : > { %2396 = vmatmul.mubr.msk.bf16.vlgmr.msra.gmra.mrb[12].mxu1 %vm831_vm3, %v818_v26 }
 0x335   : > { %2407 = vmatprep.mubr.msk.bf16.mxu1 %vm2623_vm2, %v2622_v17 }
 0x336   : > { %2402 = vmatmul.mubr.msk.bf16.vlgmr.msra.gmra.mrb[16].mxu0 %vm831_vm3, %v819_v27 }
 0x337   : > { %2413 = vmatprep.mubr.msk.bf16.mxu0 %vm2623_vm2, %v2622_v17 }
 0x38a   : > { %v872_v32 = vpop.f32.mrb[0].mxu1 }
 0x38b   : > { %v1223_v33 = vsel %vm2906_vm4, %v872_v32, -1e+09  ;;  %v2361_v34 = vpop.f32.mrb[1].mxu1 }
 0x38c   : > { %v875_v35 = vpop.f32.mrb[2].mxu1  ;;  %v1231_v36 = vsel %vm831_vm3, %v1223_v33, -inf }
 0x38d   : > { %v2362_v37 = vpop.f32.mrb[3].mxu1  ;;  %1232 = vmax.xlane.f32.xlu0 %v1231_v36 }
 0x394   : > { %v921_v38 = vpop.f32.mrb[4].mxu0 }
 0x395   : > { %v1224_v39 = vsel %vm2906_vm4, %v921_v38, -1e+09  ;;  %v2367_v40 = vpop.f32.mrb[5].mxu0 }
 0x396   : > { %v924_v41 = vpop.f32.mrb[6].mxu0  ;;  %v1234_v42 = vsel %vm831_vm3, %v1224_v39, -inf }
 0x397   : > { %1235 = vmax.xlane.f32.xlu1 %v1234_v42  ;;  %v2368_v45 = vpop.f32.mrb[7].mxu0 }
 0x3f7   : > { %v970_v47 = vpop.f32.mrb[4].mxu1 }
 0x3f8   : > { %v2918_v49 = vsel %vm2906_vm4, %v970_v47, -1e+09  ;;  %v2373_v50 = vpop.f32.mrb[5].mxu1 }
 0x3f9   : > { %v973_v52 = vpop.f32.mrb[6].mxu1  ;;  %v1019_v53 = vpop.f32.mrb[8].mxu0  ;;  %v1237_v54 = vsel %vm831_vm3, %v2918_v49, -inf }
 0x3fa   : > { %v2924_v57 = vsel %vm2906_vm4, %v1019_v53, -1e+09  ;;  %v2374_v58 = vpop.f32.mrb[7].mxu1  ;;  %1238 = vmax.xlane.f32.xlu0 %v1237_v54  ;;  %v2379_v60 = vpop.f32.mrb[9].mxu0 }
 0x3fb   : > { %v1022_v61 = vpop.f32.mrb[10].mxu0  ;;  %v1240_v63 = vsel %vm831_vm3, %v2924_v57, -inf }
 0x3fc   : > { %v2380_v62 = vpop.f32.mrb[11].mxu0 }
 0x3fe   : > { %1241 = vmax.xlane.f32.xlu0 %v1240_v63 }
 0x3ff   : > { %v1068_v0 = vpop.f32.mrb[8].mxu1 }
 0x400   : > { %v2930_v1 = vsel %vm2906_vm4, %v1068_v0, -1e+09  ;;  %v2385_v4 = vpop.f32.mrb[9].mxu1 }
 0x401   : > { %v1071_v5 = vpop.f32.mrb[10].mxu1  ;;  %v1117_v6 = vpop.f32.mrb[12].mxu0  ;;  %v1243_v7 = vsel %vm831_vm3, %v2930_v1, -inf }
 0x402   : > { %v1228_v8 = vsel %vm2906_vm4, %v1117_v6, -1e+09  ;;  %v2386_v9 = vpop.f32.mrb[11].mxu1  ;;  %1244 = vmax.xlane.f32.xlu0 %v1243_v7  ;;  %v2391_v10 = vpop.f32.mrb[13].mxu0 }
 0x403   : > { %v1120_v11 = vpop.f32.mrb[14].mxu0  ;;  %v1246_v12 = vsel %vm831_vm3, %v1228_v8, -inf }
 0x404   : > { %1247 = vmax.xlane.f32.xlu1 %v1246_v12  ;;  %v2392_v13 = vpop.f32.mrb[15].mxu0 }
 0x407   : > { %v1166_v14 = vpop.f32.mrb[12].mxu1 }
 0x408   : > { %v2939_v15 = vsel %vm2906_vm4, %v1166_v14, -1e+09  ;;  %v2397_v16 = vpop.f32.mrb[13].mxu1 }
 0x409   : > { %v1169_v18 = vpop.f32.mrb[14].mxu1  ;;  %v1215_v19 = vpop.f32.mrb[16].mxu0  ;;  %v1249_v20 = vsel %vm831_vm3, %v2939_v15, -inf }
 0x40a   : > { %v2398_v21 = vpop.f32.mrb[15].mxu1  ;;  %1250 = vmax.xlane.f32.xlu0 %v1249_v20  ;;  %v2403_v22 = vpop.f32.mrb[17].mxu0  ;;  %v1230_v28 = vsel %vm2906_vm4, %v1215_v19, -1e+09 }
 0x40b   : > { %v1218_v23 = vpop.f32.mrb[18].mxu0  ;;  %v1252_v30 = vsel %vm831_vm3, %v1230_v28, -inf }
 0x40c   : > { %v2404_v24 = vpop.f32.mrb[19].mxu0 }
 0x415   : > { %1376 = vrot.lane.b32.xlu1 %v2833_v44, %s2628_s21 }
 0x419   : > { %1424 = vrot.lane.b32.xlu1 %v2837_v46, %s2628_s21 }
 0x41a   : > { %v1233_v25 = vpop.xlane.xlu0 %1232 }
 0x41b   : > { %v1255_v26 = vsub.f32 %v1223_v33, %v1233_v25 }
 0x41d   : > { %v1263_v27 = vmul.f32 1.442695, %v1255_v26 }
 0x41f   : > { %2536 = vpow2.f32 %v1263_v27 }
 0x420   : > { %1327 = vrot.lane.b32.xlu0 %v2829_v43, %s2628_s21 }
 0x424   : > { %v1236_v43 = vpop.xlane.xlu1 %1235 }
 0x425   : > { %v1256_v46 = vsub.f32 %v1224_v39, %v1236_v43 }
 0x427   : > { %v1265_v32 = vmul.f32 1.442695, %v1256_v46 }
 0x429   : > { %v2951_v29 = vpop.eup %2536  ;;  %2538 = vpow2.f32 %v1265_v32 }
 0x42a   : > { %v1279_v44 = vsel %vm831_vm3, %v2951_v29, 0.0 }
 0x433   : > { %v2958_v33 = vpop.eup %2538 }
 0x434   : > { %v1282_v31 = vsel %vm831_vm3, %v2958_v33, 0.0 }
 0x43d   : > { %1253 = vmax.xlane.f32.xlu1 %v1252_v30 }
 0x43f   : > { %1280 = vadd.xlane.f32.xlu0 %v1279_v44 }
 0x44e   : > { %1472 = vrot.lane.b32.xlu1 %v2839_v48, %s2628_s21 }
 0x472   : > { %1283 = vadd.xlane.f32.xlu1 %v1282_v31 }
 0x483   : > { %1568 = vrot.lane.b32.xlu1 %v2856_v56, %s2628_s21 }
 0x487   : > { %v1239_v34 = vpop.xlane.xlu0 %1238 }
 0x488   : > { %v1257_v35 = vsub.f32 %v2918_v49, %v1239_v34 }
 0x48a   : > { %v1267_v36 = vmul.f32 1.442695, %v1257_v35 }
 0x48b   : > { %v1242_v37 = vpop.xlane.xlu0 %1241 }
 0x48c   : > { %2540 = vpow2.f32 %v1267_v36  ;;  %v1258_v48 = vsub.f32 %v2924_v57, %v1242_v37 }
 0x48e   : > { %v1269_v40 = vmul.f32 1.442695, %v1258_v48 }
 0x48f   : > { %v1245_v39 = vpop.xlane.xlu0 %1244 }
 0x490   : > { %2542 = vpow2.f32 %v1269_v40  ;;  %v1259_v61 = vsub.f32 %v2930_v1, %v1245_v39 }
 0x491   : > { %v1248_v38 = vpop.xlane.xlu1 %1247 }
 0x492   : > { %v1260_v41 = vsub.f32 %v1228_v8, %v1248_v38  ;;  %v1271_v62 = vmul.f32 1.442695, %v1259_v61 }
 0x494   : > { %v1273_v49 = vmul.f32 1.442695, %v1260_v41 }
 0x495   : > { %v1377_v42 = vpop.permute.xlu1 %1376 }
 0x496   : > { %v2966_v45 = vpop.eup %2540  ;;  %v1382_v47 = vsel %vm1332_vm5, %v1377_v42, 0  ;;  %2544 = vpow2.f32 %v1273_v49 }
 0x497   : > { %v1251_v50 = vpop.xlane.xlu0 %1250  ;;  %2412 = vmatpush3.bf16.msra.mxu0 %v1382_v47  ;;  %v1285_v56 = vsel %vm831_vm3, %v2966_v45, 0.0  ;;  %2546 = vpow2.f32 %v1271_v62 }
 0x498   : > { %1286 = vadd.xlane.f32.xlu0 %v1285_v56  ;;  %2423 = vmatprep.subr.bf16.mxu0 %v2622_v17  ;;  %v1261_v63 = vsub.f32 %v2939_v15, %v1251_v50 }
 0x499   : > { %v1425_v4 = vpop.permute.xlu1 %1424 }
 0x49a   : > { %v2974_v54 = vpop.eup %2542  ;;  %v1275_v0 = vmul.f32 1.442695, %v1261_v63  ;;  %v1430_v16 = vsel %vm1332_vm5, %v1425_v4, 0 }
 0x49b   : > { %v1328_v52 = vpop.permute.xlu0 %1327  ;;  %v1288_v57 = vsel %vm831_vm3, %v2974_v54, 0.0 }
 0x49c   : > { %v1334_v53 = vsel %vm1332_vm5, %v1328_v52, 0  ;;  %2548 = vpow2.f32 %v1275_v0 }
 0x49d   : > { %2406 = vmatpush3.bf16.msra.mxu1 %v1334_v53 }
 0x49e   : > { %2417 = vmatprep.subr.bf16.mxu1 %v2622_v17 }
 0x4a0   : > { %v2978_v58 = vpop.eup %2544 }
 0x4a1   : > { %v1294_v60 = vsel %vm831_vm3, %v2978_v58, 0.0  ;;  %v2986_v5 = vpop.eup %2546 }
 0x4a2   : > { %v1291_v9 = vsel %vm831_vm3, %v2986_v5, 0.0 }
 0x4a6   : > { %v2990_v10 = vpop.eup %2548 }
 0x4a7   : > { %1289 = vadd.xlane.f32.xlu1 %v1288_v57  ;;  %v1297_v1 = vsel %vm831_vm3, %v2990_v10, 0.0 }
 0x4ab   : > { %1295 = vadd.xlane.f32.xlu1 %v1294_v60 }
 0x4ae   : > { %1520 = vrot.lane.b32.xlu0 %v2847_v51, %s2628_s21 }
 0x4ca   : > { %v1254_v6 = vpop.xlane.xlu1 %1253 }
 0x4cb   : > { %v1262_v7 = vsub.f32 %v1230_v28, %v1254_v6 }
 0x4cc   : > { %v1281_v8 = vpop.xlane.xlu0 %1280 }
 0x4cd   : > { %v1277_v51 = vmul.f32 1.442695, %v1262_v7  ;;  %2550 = vrcp.f32 %v1281_v8  ;;  %1292 = vadd.xlane.f32.xlu0 %v1291_v9 }
 0x4ce   : > { %v1473_v18 = vpop.permute.xlu1 %1472 }
 0x4cf   : > { %2552 = vpow2.f32 %v1277_v51  ;;  %v1478_v23 = vsel %vm1332_vm5, %v1473_v18, 0 }
 0x4d1   : > { %1298 = vadd.xlane.f32.xlu0 %v1297_v1 }
 0x4d7   : > { %v2551_v11 = vpop.eup %2550 }
 0x4d8   : > { %v1311_v12 = vmul.f32 %v2551_v11, %v2951_v29 }
 0x4d9   : > { %v2995_v13 = vpop.eup %2552 }
 0x4da   : > { %v1300_v14 = vsel %vm831_vm3, %v2995_v13, 0.0  ;;  %v1319_v15 = vpack.c.bf16 %v1311_v12, %v1311_v12 }
 0x4db   : > { %1301 = vadd.xlane.f32.xlu1 %v1300_v14 }
 0x4dc   : > { %2408 = vmatmul.mubr.msk.bf16.vlgmr.msra.gmra.mrb[16].mxu1 %vm831_vm3, %v1319_v15  ;;  %v2524_v15 = vld [vmem:[%s3183_s18] sm:$0xff]  }
 0x4dd   : > { %2418 = vmatpush3.bf16.msra.mxu1 %v1430_v16  ;;  %2419 = vmatprep.mubr.msk.bf16.mxu1 %vm2623_vm2, %v2622_v17 }
 0x4de   : > { %2429 = vmatprep.subr.bf16.mxu1 %v2622_v17 }
 0x4e7   : > { %1616 = vrot.lane.b32.xlu0 %v2854_v55, %s2628_s21 }
 0x4ec   : > { %1664 = vrot.lane.b32.xlu1 %v2863_v59, %s2628_s21 }
 0x4ff   : > { %v1284_v19 = vpop.xlane.xlu1 %1283 }
 0x500   : > { %2554 = vrcp.f32 %v1284_v19 }
 0x503   : > { %v1569_v24 = vpop.permute.xlu1 %1568 }
 0x50a   : > { %v2555_v20 = vpop.eup %2554 }
 0x50b   : > { %v1312_v21 = vmul.f32 %v2555_v20, %v2958_v33  ;;  %v1574_v33 = vsel %vm1332_vm5, %v1569_v24, 0 }
 0x50d   : > { %v1320_v22 = vpack.c.bf16 %v1312_v21, %v1312_v21 }
 0x50f   : > { %2414 = vmatmul.mubr.msk.bf16.vlgmr.msra.gmra.mrb[20].mxu0 %vm831_vm3, %v1320_v22  ;;  %v2525_v22 = vld [vmem:[%s3183_s18 + $0x8] sm:$0xff]  }
 0x510   : > { %2424 = vmatpush3.bf16.msra.mxu0 %v1478_v23  ;;  %2425 = vmatprep.mubr.msk.bf16.mxu0 %vm2623_vm2, %v2622_v17 }
 0x511   : > { %2435 = vmatprep.subr.bf16.mxu0 %v2622_v17 }
 0x525   : > { %v1287_v55 = vpop.xlane.xlu0 %1286 }
 0x526   : > { %2556 = vrcp.f32 %v1287_v55 }
 0x529   : > { %v1521_v26 = vpop.permute.xlu0 %1520 }
 0x52a   : > { %v1526_v29 = vsel %vm1332_vm5, %v1521_v26, 0 }
 0x530   : > { %v2557_v59 = vpop.eup %2556 }
 0x531   : > { %v1313_v25 = vmul.f32 %v2557_v59, %v2966_v45 }
 0x533   : > { %v1321_v27 = vpack.c.bf16 %v1313_v25, %v1313_v25 }
 0x534   : > { %v1290_v28 = vpop.xlane.xlu1 %1289 }
 0x535   : > { %2558 = vrcp.f32 %v1290_v28  ;;  %2420 = vmatmul.mubr.msk.bf16.vlgmr.msra.gmra.mrb[20].mxu1 %vm831_vm3, %v1321_v27 }
 0x536   : > { %2430 = vmatpush3.bf16.msra.mxu1 %v1526_v29  ;;  %2431 = vmatprep.mubr.msk.bf16.mxu1 %vm2623_vm2, %v2622_v17 }
 0x537   : > { %2441 = vmatprep.subr.bf16.mxu1 %v2622_v17 }
 0x538   : > { %v1296_v30 = vpop.xlane.xlu1 %1295 }
 0x539   : > { %2560 = vrcp.f32 %v1296_v30 }
 0x53f   : > { %v2559_v44 = vpop.eup %2558 }
 0x540   : > { %v1314_v43 = vmul.f32 %v2559_v44, %v2974_v54 }
 0x542   : > { %v1322_v46 = vpack.c.bf16 %v1314_v43, %v1314_v43 }
 0x543   : > { %v2561_v32 = vpop.eup %2560 }
 0x544   : > { %2426 = vmatmul.mubr.msk.bf16.vlgmr.msra.gmra.mrb[24].mxu0 %vm831_vm3, %v1322_v46  ;;  %v1316_v31 = vmul.f32 %v2561_v32, %v2978_v58 }
 0x545   : > { %2436 = vmatpush3.bf16.msra.mxu0 %v1574_v33  ;;  %2437 = vmatprep.mubr.msk.bf16.mxu0 %vm2623_vm2, %v2622_v17 }
 0x546   : > { %2447 = vmatprep.subr.bf16.mxu0 %v2622_v17  ;;  %v1324_v34 = vpack.c.bf16 %v1316_v31, %v1316_v31 }
 0x54c   : > { %2438 = vmatmul.mubr.msk.bf16.vlgmr.msra.gmra.mrb[28].mxu0 %vm831_vm3, %v1324_v34 }
 0x54d   : > { %2449 = vmatprep.mubr.msk.bf16.mxu0 %vm2623_vm2, %v2622_v17 }
 0x55a   : > { %v1293_v35 = vpop.xlane.xlu0 %1292 }
 0x55b   : > { %2562 = vrcp.f32 %v1293_v35 }
 0x55e   : > { %v1299_v36 = vpop.xlane.xlu0 %1298 }
 0x55f   : > { %2564 = vrcp.f32 %v1299_v36 }
 0x562   : > { %v1617_v38 = vpop.permute.xlu0 %1616 }
 0x563   : > { %v1622_v42 = vsel %vm1332_vm5, %v1617_v38, 0 }
 0x565   : > { %v2563_v37 = vpop.eup %2562 }
 0x566   : > { %v1315_v48 = vmul.f32 %v2563_v37, %v2986_v5 }
 0x568   : > { %v1302_v39 = vpop.xlane.xlu1 %1301  ;;  %v1323_v40 = vpack.c.bf16 %v1315_v48, %v1315_v48 }
 0x569   : > { %v2565_v41 = vpop.eup %2564  ;;  %2566 = vrcp.f32 %v1302_v39 }
 0x56a   : > { %2432 = vmatmul.mubr.msk.bf16.vlgmr.msra.gmra.mrb[24].mxu1 %vm831_vm3, %v1323_v40  ;;  %v1317_v45 = vmul.f32 %v2565_v41, %v2990_v10 }
 0x56b   : > { %2442 = vmatpush3.bf16.msra.mxu1 %v1622_v42  ;;  %2443 = vmatprep.mubr.msk.bf16.mxu1 %vm2623_vm2, %v2622_v17 }
 0x56c   : > { %v1665_v47 = vpop.permute.xlu1 %1664  ;;  %2453 = vmatprep.subr.bf16.mxu1 %v2622_v17  ;;  %v1325_v56 = vpack.c.bf16 %v1317_v45, %v1317_v45  ;;  %v2277_v45 = vld [vmem:[%s3184_s29] ss:$0 sm:$0xff] }
 0x56d   : > { %v1670_v50 = vsel %vm1332_vm5, %v1665_v47, 0 }
 0x56e   : > { %2448 = vmatpush3.bf16.msra.mxu0 %v1670_v50 }
 0x56f   : > { %2461 = vmatprep.subr.bf16.mxu0 %v2622_v17 }
 0x572   : > { %2444 = vmatmul.mubr.msk.bf16.vlgmr.msra.gmra.mrb[28].mxu1 %vm831_vm3, %v1325_v56 }
 0x573   : > { %v2567_v49 = vpop.eup %2566  ;;  %2457 = vmatprep.mubr.msk.bf16.mxu1 %vm2623_vm2, %v2622_v17  ;;  %2454 = vmatpush3.bf16.msra.mxu1 %v2524_v15  ;;  %v2278_v15 = vld [vmem:[%s633_s13] ss:$0 sm:$0xff] }
 0x574   : > { %v1318_v52 = vmul.f32 %v2567_v49, %v2995_v13  ;;  %2455 = vmatprep.subr.bf16.mxu1 %v2622_v17 }
 0x576   : > { %v1326_v53 = vpack.c.bf16 %v1318_v52, %v1318_v52 }
 0x577   : > { %2456 = vmatpush3.bf16.msra.mxu1 %v2525_v22 }
 0x578   : > { %2450 = vmatmul.mubr.msk.bf16.vlgmr.msra.gmra.mrb[32].mxu0 %vm831_vm3, %v1326_v53  ;;  %2469 = vmatprep.subr.bf16.mxu1 %v2622_v17 }
 0x579   : > { %2465 = vmatprep.mubr.msk.bf16.mxu0 %vm2623_vm2, %v2622_v17 }
 0x5af   : > { %v1370_v54 = vpop.f32.mrb[16].mxu1 }
 0x5b0   : > { %v2409_v57 = vpop.f32.mrb[17].mxu1 }
 0x5b1   : > { %v1373_v58 = vpop.f32.mrb[18].mxu1 }
 0x5b2   : > { %v2410_v60 = vpop.f32.mrb[19].mxu1 }
 0x5e2   : > { %v1418_v61 = vpop.f32.mrb[20].mxu0 }
 0x5e3   : > { %v2415_v62 = vpop.f32.mrb[21].mxu0 }
 0x5e4   : > { %v1421_v63 = vpop.f32.mrb[22].mxu0 }
 0x5e5   : > { %v2416_v0 = vpop.f32.mrb[23].mxu0 }
 0x608   : > { %v1466_v4 = vpop.f32.mrb[20].mxu1 }
 0x609   : > { %v2421_v5 = vpop.f32.mrb[21].mxu1 }
 0x60a   : > { %v1469_v6 = vpop.f32.mrb[22].mxu1 }
 0x60b   : > { %v2422_v7 = vpop.f32.mrb[23].mxu1 }
 0x60c   : > { %v2526_v7 = vld [vmem:[%s2766_s3] sm:$0xff]  }
 0x60d   : > { %2462 = vmatpush3.bf16.msra.mxu0 %v2526_v7 }
 0x60e   : > { %2463 = vmatprep.subr.bf16.mxu0 %v2622_v17 }
 0x617   : > { %v1514_v8 = vpop.f32.mrb[24].mxu0 }
 0x618   : > { %v2507_v9 = vpack.i.bf16 %v1514_v8, %v1466_v4  ;;  %v2427_v10 = vpop.f32.mrb[25].mxu0  ;;  %v2527_v8 = vld [vmem:[%s2766_s3 + $0x8] sm:$0xff]  }
 0x619   : > { %v1517_v51 = vpop.f32.mrb[26].mxu0  ;;  %2464 = vmatpush3.bf16.msra.mxu0 %v2527_v8 }
 0x61a   : > { %2508 = vrot.lane.b32.xlu0 %v2507_v9, %s2629_s22  ;;  %v2428_v1 = vpop.f32.mrb[27].mxu0 }
 0x61f   : > { %v1610_v11 = vpop.f32.mrb[28].mxu0 }
 0x620   : > { %v2439_v12 = vpop.f32.mrb[29].mxu0 }
 0x621   : > { %v1613_v13 = vpop.f32.mrb[30].mxu0 }
 0x622   : > { %v2440_v14 = vpop.f32.mrb[31].mxu0 }
 0x63d   : > { %v1562_v16 = vpop.f32.mrb[24].mxu1 }
 0x63e   : > { %v2512_v18 = vpack.i.bf16 %v1610_v11, %v1562_v16  ;;  %v2433_v19 = vpop.f32.mrb[25].mxu1 }
 0x63f   : > { %v1565_v20 = vpop.f32.mrb[26].mxu1 }
 0x640   : > { %v2434_v21 = vpop.f32.mrb[27].mxu1  ;;  %2513 = vrot.lane.b32.xlu1 %v2512_v18, %s2630_s14  ;;  %v2279_v20 = vld [vmem:[%s636_s30] ss:$0 sm:$0xff]  ;;  %s3186_s14 = sld [smem:[#allocation11_spill]] (!%p2292_p5) }
 0x645   : > { %v1658_v23 = vpop.f32.mrb[28].mxu1 }
 0x646   : > { %v2445_v55 = vpop.f32.mrb[29].mxu1 }
 0x647   : > { %v1661_v59 = vpop.f32.mrb[30].mxu1 }
 0x648   : > { %v2446_v24 = vpop.f32.mrb[31].mxu1  ;;  %v2528_v59 = vld [vmem:[%s2776_s24] sm:$0xff]  }
 0x649   : > { %v2529_v24 = vld [vmem:[%s2776_s24 + $0x8] sm:$0xff]  }
 0x64b   : > { %v1706_v25 = vpop.f32.mrb[32].mxu0 }
 0x64c   : > { %v2517_v26 = vpack.i.bf16 %v1706_v25, %v1658_v23  ;;  %v2451_v27 = vpop.f32.mrb[33].mxu0  ;;  %v2530_v25 = vld [vmem:[%s2776_s24 + $0x10] sm:$0xff]  }
 0x64d   : > { %v1709_v28 = vpop.f32.mrb[34].mxu0  ;;  %v2280_v27 = vld [vmem:[%s644_s5] ss:$0 sm:$0xff] }
 0x64e   : > { %2518 = vrot.lane.b32.xlu0 %v2517_v26, %s2631_s23  ;;  %v2452_v29 = vpop.f32.mrb[35].mxu0  ;;  %v2531_v26 = vld [vmem:[%s2776_s24 + $0x18] sm:$0xff]  }
 0x68c   : > { %v2509_v30 = vpop.permute.xlu0 %2508 }
 0x68d   : > { %v2511_v43 = vunpack.i.h.bf16 %v2509_v30  ;;  %v2510_v46 = vunpack.i.l.bf16 %v2509_v30 }
 0x68f   : > { %v1737_v34 = vsel %vm831_vm3, %v1418_v61, %v2511_v43  ;;  %v1736_v35 = vsel %vm831_vm3, %v1370_v54, %v2510_v46 }
 0x6b2   : > { %v2514_v44 = vpop.permute.xlu1 %2513 }
 0x6b3   : > { %v2516_v32 = vunpack.i.h.bf16 %v2514_v44  ;;  %v2515_v33 = vunpack.i.l.bf16 %v2514_v44 }
 0x6b5   : > { %v1740_v48 = vsel %vm1738_vm6, %v1737_v34, %v2516_v32  ;;  %v1739_v38 = vsel %vm1738_vm6, %v1736_v35, %v2515_v33 }
 0x6c0   : > { %v2519_v31 = vpop.permute.xlu0 %2518 }
 0x6c1   : > { %v2521_v36 = vunpack.i.h.bf16 %v2519_v31  ;;  %v2520_v37 = vunpack.i.l.bf16 %v2519_v31 }
 0x6c3   : > { %v1743_v39 = vsel %vm1741_vm7, %v1740_v48, %v2521_v36  ;;  %v1742_v40 = vsel %vm1741_vm7, %v1739_v38, %v2520_v37 }
 0x6c4   : > { %v1744_v41 = vpack.c.bf16 %v1743_v39, %v1742_v40 }
 0x6c6   : > { %2458 = vmatmul.mubr.msk.bf16.vlgmr.msra.gmra.mrb[32].mxu1 %vm667_vm1, %v1744_v41 }
 0x6c7   : > { %2477 = vmatprep.mubr.msk.bf16.mxu1 %vm2623_vm2, %v2622_v17  ;;  %2470 = vmatpush3.bf16.msra.mxu1 %v2528_v59 }
 0x6c8   : > { %2471 = vmatprep.subr.bf16.mxu1 %v2622_v17 }
 0x6cb   : > { %2472 = vmatpush3.bf16.msra.mxu1 %v2529_v24 }
 0x6cc   : > { %2473 = vmatprep.subr.bf16.mxu1 %v2622_v17 }
 0x6cf   : > { %2474 = vmatpush3.bf16.msra.mxu1 %v2530_v25 }
 0x6d0   : > { %2475 = vmatprep.subr.bf16.mxu1 %v2622_v17 }
 0x6d3   : > { %2476 = vmatpush3.bf16.msra.mxu1 %v2531_v26 }
 0x799   : > { %v1798_v42 = vpop.f32.mrb[32].mxu1 }
 0x79a   : > { %v1805_v47 = vadd.f32 %v1798_v42, %v2789_v2  ;;  %v2459_v50 = vpop.f32.mrb[33].mxu1  ;;  %v2286_v42 = vld [vmem:[%s652_s28] ss:$0 sm:$0xff] }
 0x79b   : > { %v1801_v56 = vpop.f32.mrb[34].mxu1 }
 0x79c   : > { %v3062_v49 = vadd.f32 %v2277_v45, %v1805_v47  ;;  %v1806_v52 = vadd.f32 %v1801_v56, %v2791_v3  ;;  %v2460_v53 = vpop.f32.mrb[35].mxu1 }
 0x79e   : > { %v3065_v54 = vadd.f32 %v2277_v45, %v1806_v52  ;;  %v1818_v57 = vsel %vm667_vm1, %v3062_v49, 0.0 }
 0x79f   : > { %1819 = vadd.xlane.f32.xlu1 %v1818_v57 }
 0x7a0   : > { %v1821_v58 = vsel %vm667_vm1, %v3065_v54, 0.0 }
 0x7a1   : > { %1822 = vadd.xlane.f32.xlu0 %v1821_v58 }
 0x82c   : > { %v1820_v2 = vpop.xlane.xlu1 %1819 }
 0x82d   : > { %v1824_v60 = vmul.f32 0.03125, %v1820_v2 }
 0x82e   : > { %v1823_v61 = vpop.xlane.xlu0 %1822 }
 0x82f   : > { %v1826_v62 = vsub.f32 %v3062_v49, %v1824_v60  ;;  %v1825_v63 = vmul.f32 0.03125, %v1823_v61 }
 0x831   : > { %v1827_v3 = vsub.f32 %v3065_v54, %v1825_v63  ;;  %v1828_v0 = vmul.f32 %v1826_v62, %v1826_v62 }
 0x833   : > { %v1830_v4 = vsel %vm667_vm1, %v1828_v0, 0.0  ;;  %v1829_v5 = vmul.f32 %v1827_v3, %v1827_v3 }
 0x834   : > { %1831 = vadd.xlane.f32.xlu0 %v1830_v4 }
 0x835   : > { %v1833_v6 = vsel %vm667_vm1, %v1829_v5, 0.0 }
 0x838   : > { %1834 = vadd.xlane.f32.xlu0 %v1833_v6 }
 0x8c1   : > { %v1832_v9 = vpop.xlane.xlu0 %1831 }
 0x8c2   : > { %v1836_v10 = vmul.f32 0.03125, %v1832_v9 }
 0x8c4   : > { %v1838_v51 = vadd.f32 1e-05, %v1836_v10 }
 0x8c5   : > { %v1835_v1 = vpop.xlane.xlu0 %1834 }
 0x8c6   : > { %2568 = vrsqrt.f32 %v1838_v51  ;;  %v1837_v11 = vmul.f32 0.03125, %v1835_v1 }
 0x8c8   : > { %v1839_v12 = vadd.f32 1e-05, %v1837_v11 }
 0x8ca   : > { %2570 = vrsqrt.f32 %v1839_v12  ;;  %v2293_v12 = vld [vmem:[%s3185_s15] ss:$0 sm:$0xff] (!%p2292_p5) }
 0x8d0   : > { %v2569_v13 = vpop.eup %2568 }
 0x8d1   : > { %v1842_v14 = vmul.f32 %v2569_v13, %v1826_v62 }
 0x8d3   : > { %v1850_v18 = vmul.f32 %v2278_v15, %v1842_v14  ;;  %v2294_v14 = vld [vmem:[%s3186_s14] ss:$0 sm:$0xff] (!%p2292_p5) }
 0x8d4   : > { %v2571_v16 = vpop.eup %2570 }
 0x8d5   : > { %v1843_v19 = vmul.f32 %v2571_v16, %v1827_v3  ;;  %v1858_v22 = vadd.f32 %v2279_v20, %v1850_v18 }
 0x8d7   : > { %v1851_v21 = vmul.f32 %v2278_v15, %v1843_v19 }
 0x8d9   : > { %v1859_v23 = vadd.f32 %v2279_v20, %v1851_v21 }
 0x8db   : > { %v1860_v55 = vpack.c.bf16 %v1859_v23, %v1858_v22 }
 0x8dd   : > { %2466 = vmatmul.mubr.msk.bf16.vlgmr.msra.gmra.mrb[36].mxu0 %vm667_vm1, %v1860_v55 }
 0x9b0   : > { %v1921_v28 = vpop.f32.mrb[36].mxu0 }
 0x9b1   : > { %v1922_v29 = vadd.f32 %v2280_v27, %v1921_v28  ;;  %v2467_v30 = vpop.f32.mrb[37].mxu0 }
 0x9b2   : > { %v1924_v44 = vpop.f32.mrb[38].mxu0 }
 0x9b3   : > { %v2284_v43 = vmul.f32 -1.702, %v1922_v29  ;;  %v1925_v46 = vadd.f32 %v2280_v27, %v1924_v44  ;;  %v2468_v32 = vpop.f32.mrb[39].mxu0 }
 0x9b5   : > { %v1932_v33 = vmul.f32 1.442695, %v2284_v43  ;;  %v2285_v31 = vmul.f32 -1.702, %v1925_v46 }
 0x9b7   : > { %2572 = vpow2.f32 %v1932_v33  ;;  %v1934_v34 = vmul.f32 1.442695, %v2285_v31 }
 0x9b9   : > { %2574 = vpow2.f32 %v1934_v34 }
 0x9c1   : > { %v2573_v17 = vpop.eup %2572 }
 0x9c2   : > { %v1936_v35 = vadd.f32 1.0, %v2573_v17 }
 0x9c3   : > { %v2575_v36 = vpop.eup %2574 }
 0x9c4   : > { %2576 = vrcp.f32 %v1936_v35  ;;  %v1937_v37 = vadd.f32 1.0, %v2575_v36 }
 0x9c6   : > { %2578 = vrcp.f32 %v1937_v37 }
 0x9ce   : > { %v2577_v48 = vpop.eup %2576 }
 0x9cf   : > { %v1942_v39 = vmul.f32 %v2577_v48, %v1922_v29 }
 0x9d0   : > { %v2579_v38 = vpop.eup %2578 }
 0x9d1   : > { %v1943_v40 = vmul.f32 %v2579_v38, %v1925_v46 }
 0x9d3   : > { %v1944_v41 = vpack.c.bf16 %v1943_v40, %v1942_v39 }
 0x9d5   : > { %2478 = vmatmul.mubr.msk.bf16.vlgmr.msra.gmra.mrb[36].mxu1 %vm1984_vm8, %v1944_v41 }
 0xaa8   : > { %v2022_v45 = vpop.f32.mrb[36].mxu1 }
 0xaa9   : > { %v2023_v47 = vadd.f32 %v2286_v42, %v2022_v45  ;;  %v2479_v50 = vpop.f32.mrb[37].mxu1  ;;  %2036 = sbr.rel (%p2292_p5) target bundleno = 3051 (0xbeb), region = 88 }
 0xaaa   : > { %v2025_v56 = vpop.f32.mrb[38].mxu1 }
 0xaab   : > { %v2029_v52 = vadd.f32 %v2023_v47, %v3062_v49  ;;  %v2026_v53 = vadd.f32 %v2286_v42, %v2025_v56  ;;  %v2480_v57 = vpop.f32.mrb[39].mxu1 }
 0xaad   : > { %2031 = vst.msk [vmem:[#allocation2] sm:$0xff] %vm667_vm1, %v2029_v52  ;;  %v2030_v58 = vadd.f32 %v2026_v53, %v3065_v54  ;;  %v2039_v2 = vsel (!%p2292_p5), %vm667_vm1, %v2029_v52, 0.0 }
 0xaae   : > { %2040 = vadd.xlane.f32.xlu0 (!%p2292_p5), %v2039_v2 }
 0xaaf   : > { %2032 = vst.msk [vmem:[#allocation2 + $0x8] sm:$0xff] %vm667_vm1, %v2030_v58  ;;  %v2042_v60 = vsel (!%p2292_p5), %vm667_vm1, %v2030_v58, 0.0 }
 0xab2   : > { %2043 = vadd.xlane.f32.xlu0 %v2042_v60 }
 0xb3b   : > { %v2041_v61 = vpop.xlane.xlu0 %2040 }
 0xb3c   : > { %v2045_v62 = vmul.f32 0.03125, %v2041_v61 }
 0xb3e   : > { %v2047_v49 = vsub.f32 %v2029_v52, %v2045_v62 }
 0xb3f   : > { %v2044_v63 = vpop.xlane.xlu0 %2043 }
 0xb40   : > { %v2046_v3 = vmul.f32 0.03125, %v2044_v63  ;;  %v2049_v0 = vmul.f32 %v2047_v49, %v2047_v49 }
 0xb42   : > { %v2048_v4 = vsub.f32 %v2030_v58, %v2046_v3  ;;  %v2051_v54 = vsel %vm667_vm1, %v2049_v0, 0.0 }
 0xb43   : > { %2052 = vadd.xlane.f32.xlu1 %v2051_v54 }
 0xb44   : > { %v2050_v5 = vmul.f32 %v2048_v4, %v2048_v4 }
 0xb46   : > { %v2054_v6 = vsel %vm667_vm1, %v2050_v5, 0.0 }
 0xb47   : > { %2055 = vadd.xlane.f32.xlu1 %v2054_v6 }
 0xbd0   : > { %v2053_v7 = vpop.xlane.xlu1 %2052 }
 0xbd1   : > { %v2057_v8 = vmul.f32 0.03125, %v2053_v7 }
 0xbd3   : > { %v2059_v9 = vadd.f32 1e-05, %v2057_v8 }
 0xbd4   : > { %v2056_v10 = vpop.xlane.xlu1 %2055 }
 0xbd5   : > { %2580 = vrsqrt.f32 %v2059_v9  ;;  %v2058_v51 = vmul.f32 0.03125, %v2056_v10 }
 0xbd7   : > { %v2060_v1 = vadd.f32 1e-05, %v2058_v51 }
 0xbd9   : > { %2582 = vrsqrt.f32 %v2060_v1 }
 0xbdf   : > { %v2581_v11 = vpop.eup %2580 }
 0xbe0   : > { %v2063_v13 = vmul.f32 %v2581_v11, %v2047_v49 }
 0xbe2   : > { %v2071_v15 = vmul.f32 %v2293_v12, %v2063_v13 }
 0xbe3   : > { %v2583_v16 = vpop.eup %2582 }
 0xbe4   : > { %v2079_v18 = vadd.f32 %v2294_v14, %v2071_v15  ;;  %v2064_v19 = vmul.f32 %v2583_v16, %v2048_v4 }
 0xbe6   : > { %2081 = vst.msk [vmem:[#allocation3] sm:$0xff] %vm667_vm1, %v2079_v18  ;;  %v2072_v20 = vmul.f32 %v2293_v12, %v2064_v19 }
 0xbe8   : > { %v2080_v21 = vadd.f32 %v2294_v14, %v2072_v20 }
 0xbea   : > { %2082 = vst.msk [vmem:[#allocation3 + $0x8] sm:$0xff] %vm667_vm1, %v2080_v21 }
 0xbeb PF: > { %p2485_p6 = scmp.eq.s32.totalorder %s2720_s19, 1  ;;  %s2632_s23 = smov [#allocation3]  }
 0xbec   : > { %s2089_s26 = sshll.u32 %s2632_s23, 4  ;;  %s2090_s26 = int_to_ptr.vmem [resolvable:$true] %s2089_s26 }
 0xbed   : > { %s2584_s25 = scalar_lea.vmem %s2090_s26, 256  ;;  %p2591_p10 = scmp.lt.s32.totalorder %s2090_s26, %s2090_s26 }
 0xbee   : > { %p2585_p7 = scmp.ne.s32.totalorder %s2090_s26, %s2584_s25  ;;  %p2592_p11 = scmp.lt.s32.totalorder %s2584_s25, %s2584_s25 }
 0xbf0   : > { %p2586_p8 = pnand %p2585_p7, %p2485_p6  ;;  %p2593_p12 = por %p2592_p11, %p2591_p10 }
 0xbf2   : > { %p2587_p9 = pneg %p2586_p8 }
 0xbf4   : > { %p2594_p13 = pnand %p2593_p12, %p2587_p9 }
 0xbf6   : > { %2597 = shalt.err (!%p2594_p13)
}
 0xbf7   : > { %s3187_s16 = sld [smem:[#allocation12_spill]] }
 0xbfd   : > { %s2598_s3 = scalar_lea.hbm %s3187_s16, 256 }
 0xbfe   : > { %p2599_p0 = scmp.ne.s32.totalorder %s3187_s16, %s2598_s3  ;;  %p2604_p3 = scmp.lt.u32.totalorder %s2598_s3, %s3187_s16 }
 0xc00   : > { %p2600_p1 = pnand %p2599_p0, %p2485_p6 }
 0xc02   : > { %p2601_p2 = pneg %p2600_p1 }
 0xc04   : > { %p2606_p4 = pnand %p2604_p3, %p2601_p2 }
 0xc06   : > { %2609 = shalt.err (!%p2606_p4)
}
 0xc07   : > { %s2633_s24 = smov 128  }
 0xc08   : > { %2482 = dma.vmem_to_hbm [thread:$0]  (%p2485_p6), %s2090_s26, 256, %s3187_s16, [#allocation4], %s2633_s24, %s2633_s24, %s2629_s22  }
 0xc09   : > { %2615 = dma.done.wait (%p2485_p6), [#allocation4], 256  }
 0xc0a   : > { %2617 = vsyncadd (%p2485_p6), [#allocation4], 4294967040 }
 0xc0b PF: > { %s3188_s15 = sld [smem:[#allocation6_spill]] }
 0xc11   : > { %s26_s18 = sadd.s32 1, %s3188_s15  }
 0xc12   : > { %p23_p5 = scmp.ge.s32.totalorder %s26_s18, 4  }
 0xc14   :  { %25 = sbr.rel (!%p23_p5) target bundleno = 7 (0x7), region = 148 }
 0xc1b   :  { %2105 = vsyncpa [#allocation4], 1 }
 0xc1c   :  { %2107 = vsyncpa [#allocation4 + $0x1], 1 }

</bundles_post_ra>
